<compile_context>
chip_gen: v6e
topology: v6e:2x2x1
jax: 0.10.0
libtpu: 0.0.40
codegen_flags: <defaults>
</compile_context>

<pallas_src>
import functools

import jax
import jax.numpy as jnp
from jax import lax
from jax.experimental import pallas as pl
from jax.experimental.pallas import tpu as pltpu


def _round_up(x, m):
    return ((x + m - 1) // m) * m


# -----------------------------------------------------------------------------
# Pallas kernel: fused embedding-projection + LSTM recurrence + FC + sigmoid
# -----------------------------------------------------------------------------
def candle_lstm_kernel(cand_ref,   # (T, Bb, 1) int32  candle ids (batch block)
                       vol_ref,    # (T, Bb, 1) f32    volumes
                       embp_ref,   # (V, 4*Hp)         embedding @ W_ih_emb (padded)
                       wvol_ref,   # (1, 4*Hp) f32     W_ih row for the volume feature
                       b_ref,      # (1, 4*Hp) f32     b_ih + b_hh (padded)
                       whh_ref,    # (Hp, 4*Hp)        W_hh^T (padded per gate block)
                       wfc_ref,    # (Hp, Op)          W_fc^T (padded rows/cols)
                       bfc_ref,    # (1, Op)  f32
                       out_ref,    # (Bb, Op) f32
                       *, T, Bb, Hp):
    V = embp_ref.shape[0]
    TB = T * Bb

    # Tiny t-major index / volume columns (whole tiles since Bb % 8 == 0).
    cand = cand_ref[...].reshape(TB, 1)
    vol = vol_ref[...].reshape(TB, 1)

    # ---- hoisted input projection (one matmul for all timesteps) -------------
    # one-hot(x_candle) @ (embedding @ W_ih_emb)  ==  embedding-lookup @ W_ih_emb
    onehot = (cand == lax.broadcasted_iota(jnp.int32, (TB, V), 1)
              ).astype(embp_ref.dtype)
    gates_x = (jnp.dot(onehot, embp_ref[...], preferred_element_type=jnp.float32)
               + vol * wvol_ref[...]
               + b_ref[...])                                      # (TB, 4Hp) f32

    # ---- recurrence: only h @ W_hh on the serial critical path ---------------
    whh = whh_ref[...]                 # invariant load, hoisted out of the loop
    mm_dtype = whh.dtype

    h = jnp.zeros((Bb, Hp), jnp.float32)
    c = jnp.zeros((Bb, Hp), jnp.float32)
    # T is tiny & static -> full unroll; slices below are static, sublane- and
    # lane-aligned (row offsets multiples of 8, column offsets multiples of 128).
    for t in range(T):
        gates = (gates_x[t * Bb:(t + 1) * Bb, :]
                 + jnp.dot(h.astype(mm_dtype), whh,
                           preferred_element_type=jnp.float32))   # (Bb, 4Hp) f32
        i_g = jax.nn.sigmoid(gates[:, 0 * Hp:1 * Hp])
        f_g = jax.nn.sigmoid(gates[:, 1 * Hp:2 * Hp])
        g_g = jnp.tanh(gates[:, 2 * Hp:3 * Hp])
        o_g = jax.nn.sigmoid(gates[:, 3 * Hp:4 * Hp])
        c = f_g * c + i_g * g_g
        h = o_g * jnp.tanh(c)
    # Padded H lanes stay exactly 0: their gates are 0 -> g = tanh(0) = 0, c0 = 0.

    # ---- last-step FC head + sigmoid (lane-dense: Op is a multiple of 128) ---
    logits = (jnp.dot(h.astype(wfc_ref.dtype), wfc_ref[...],
                      preferred_element_type=jnp.float32) + bfc_ref[...])
    out_ref[...] = jax.nn.sigmoid(logits)


# -----------------------------------------------------------------------------
# Wrapper: batch padding/tiling + pallas_call
# -----------------------------------------------------------------------------
def candle_lstm_forward(kparams, x_candle, x_volume, *, output_dim,
                        batch_block=None):
    """x_candle: (B, T) int, x_volume: (B, T) float -> (B, output_dim) probs.

    batch_block: rows of the padded batch processed per grid step (multiple of
    8).  At production batch sizes pick it to keep T*Bb*4*Hp*4 bytes of gates_x
    well under VMEM (use ~half the v5e/v6e value on v7x: 64 MiB VMEM).
    """
    B, T = x_candle.shape
    Hp = kparams["w_hh_p"].shape[0]
    Op = kparams["w_fc_p"].shape[1]

    if batch_block is None:
        batch_block = _round_up(max(B, 1), 8)
    Bb = _round_up(batch_block, 8)
    Bpt = _round_up(max(B, 1), Bb)          # total padded batch
    n_blk = Bpt // Bb

    # t-major, batch-padded index / volume columns (padding: id 0, volume 0 —
    # the extra rows compute throwaway state and are sliced off below).
    cand = jnp.zeros((T, Bpt, 1), jnp.int32)
    cand = cand.at[:, :B, 0].set(x_candle.astype(jnp.int32).T)
    vol = jnp.zeros((T, Bpt, 1), jnp.float32)
    vol = vol.at[:, :B, 0].set(x_volume.astype(jnp.float32).T)

    kernel = functools.partial(candle_lstm_kernel, T=T, Bb=Bb, Hp=Hp)

    def full_spec(a):
        return pl.BlockSpec(a.shape, lambda i, _nd=a.ndim: (0,) * _nd)

    out = pl.pallas_call(
        kernel,
        out_shape=jax.ShapeDtypeStruct((Bpt, Op), jnp.float32),
        grid=(n_blk,),
        in_specs=[
            pl.BlockSpec((T, Bb, 1), lambda i: (0, i, 0)),   # cand
            pl.BlockSpec((T, Bb, 1), lambda i: (0, i, 0)),   # vol
            full_spec(kparams["emb_proj"]),
            full_spec(kparams["w_vol"]),
            full_spec(kparams["b"]),
            full_spec(kparams["w_hh_p"]),
            full_spec(kparams["w_fc_p"]),
            full_spec(kparams["b_fc"]),
        ],
        out_specs=pl.BlockSpec((Bb, Op), lambda i: (i, 0)),
        compiler_params=pltpu.CompilerParams(
            dimension_semantics=("parallel",)),               # v7x: both TCs
    )(cand, vol,
      kparams["emb_proj"], kparams["w_vol"], kparams["b"],
      kparams["w_hh_p"], kparams["w_fc_p"], kparams["b_fc"])

    return out[:B, :output_dim]


# -----------------------------------------------------------------------------
# Parameter prep: PyTorch-layout params -> fused / lane-padded kernel params
# -----------------------------------------------------------------------------
def prepare_kernel_params(p, hidden_dim, matmul_dtype=jnp.bfloat16):
    """matmul_dtype=jnp.bfloat16 (default) is recommended on v5e/v6e/v7x — the
    MXU is bf16-native on all three; biases / gate math / h,c state stay f32.
    Use matmul_dtype=jnp.float32 for bit-tight validation."""
    H = hidden_dim
    Hp = _round_up(H, 128)          # lane-align each gate block
    E = p["embedding"].shape[1]
    I = E + 1
    O = p["w_fc"].shape[0]
    Op = _round_up(O, 128)          # lane-dense FC head / output

    w_ih_t = p["w_ih"].T            # (I, 4H), columns ordered [i | f | g | o]
    w_hh_t = p["w_hh"].T            # (H, 4H)
    b = p["b_ih"] + p["b_hh"]       # (4H,)

    w_ih_p = jnp.zeros((I, 4 * Hp), jnp.float32)
    w_hh_p = jnp.zeros((Hp, 4 * Hp), jnp.float32)
    b_p = jnp.zeros((1, 4 * Hp), jnp.float32)
    for k in range(4):
        w_ih_p = w_ih_p.at[:, k * Hp:k * Hp + H].set(w_ih_t[:, k * H:(k + 1) * H])
        w_hh_p = w_hh_p.at[:H, k * Hp:k * Hp + H].set(w_hh_t[:, k * H:(k + 1) * H])
        b_p = b_p.at[:, k * Hp:k * Hp + H].set(b[k * H:(k + 1) * H])

    # Fuse the embedding table with the embedding part of W_ih (done once).
    emb_proj = p["embedding"].astype(jnp.float32) @ w_ih_p[:E, :]   # (V, 4Hp)
    w_vol = w_ih_p[E:E + 1, :]                                      # (1, 4Hp)

    w_fc_p = jnp.zeros((Hp, Op), jnp.float32)
    w_fc_p = w_fc_p.at[:H, :O].set(p["w_fc"].T)                     # (Hp, Op)
    b_fc_p = jnp.zeros((1, Op), jnp.float32)
    b_fc_p = b_fc_p.at[:, :O].set(p["b_fc"])

    return {
        "emb_proj": emb_proj.astype(matmul_dtype),
        "w_vol": w_vol,                       # f32 (added post-matmul)
        "b": b_p,                             # f32
        "w_hh_p": w_hh_p.astype(matmul_dtype),
        "w_fc_p": w_fc_p.astype(matmul_dtype),
        "b_fc": b_fc_p,                       # f32
    }


# -----------------------------------------------------------------------------
# Pure-JAX reference (mirrors the PyTorch module exactly, unpadded params)
# -----------------------------------------------------------------------------
def candle_lstm_ref(p, x_candle, x_volume):
    emb = jnp.take(p["embedding"], x_candle, axis=0)
    x = jnp.concatenate([emb, x_volume[..., None]], axis=-1).astype(jnp.float32)
    B, T, _ = x.shape
    H = p["w_hh"].shape[1]
    w_ih_t = p["w_ih"].T
    w_hh_t = p["w_hh"].T
    b = (p["b_ih"] + p["b_hh"])[None, :]

    def step(carry, x_t):
        h, c = carry
        gates = x_t @ w_ih_t + h @ w_hh_t + b
        i_g = jax.nn.sigmoid(gates[:, 0 * H:1 * H])
        f_g = jax.nn.sigmoid(gates[:, 1 * H:2 * H])
        g_g = jnp.tanh(gates[:, 2 * H:3 * H])
        o_g = jax.nn.sigmoid(gates[:, 3 * H:4 * H])
        c = f_g * c + i_g * g_g
        h = o_g * jnp.tanh(c)
        return (h, c), None

    h0 = jnp.zeros((B, H), jnp.float32)
    c0 = jnp.zeros((B, H), jnp.float32)
    (h_last, _), _ = lax.scan(step, (h0, c0), jnp.transpose(x, (1, 0, 2)))
    return jax.nn.sigmoid(h_last @ p["w_fc"].T + p["b_fc"][None, :])


# -----------------------------------------------------------------------------
# Deterministic PyTorch-layout parameter init (shapes from CandleLSTM.__init__)
# -----------------------------------------------------------------------------
def init_params(key, vocab_size, embedding_dim, hidden_dim, output_dim):
    I = embedding_dim + 1
    ks = jax.random.split(key, 7)
    s = 0.1
    return {
        "embedding": s * jax.random.normal(ks[0], (vocab_size, embedding_dim), jnp.float32),
        "w_ih": s * jax.random.normal(ks[1], (4 * hidden_dim, I), jnp.float32),
        "w_hh": s * jax.random.normal(ks[2], (4 * hidden_dim, hidden_dim), jnp.float32),
        "b_ih": s * jax.random.normal(ks[3], (4 * hidden_dim,), jnp.float32),
        "b_hh": s * jax.random.normal(ks[4], (4 * hidden_dim,), jnp.float32),
        "w_fc": s * jax.random.normal(ks[5], (output_dim, hidden_dim), jnp.float32),
        "b_fc": s * jax.random.normal(ks[6], (output_dim,), jnp.float32),
    }


if __name__ == "__main__":
    vocab_size, embedding_dim, hidden_dim, output_dim = 16, 31, 32, 4
    B, T = 2, 8

    key = jax.random.PRNGKey(0)
    kp, kc, kv = jax.random.split(key, 3)
    params = init_params(kp, vocab_size, embedding_dim, hidden_dim, output_dim)

    # Candle ids are guaranteed in [0, V) (one-hot trick maps OOB ids to zero rows).
    x_candle = jax.random.randint(kc, (B, T), 0, vocab_size, dtype=jnp.int32)
    x_volume = jax.random.uniform(kv, (B, T), dtype=jnp.float32)

    ref = jax.block_until_ready(candle_lstm_ref(params, x_candle, x_volume))

    fwd = jax.jit(functools.partial(candle_lstm_forward, output_dim=output_dim))

    # 1) f32 MXU operands: tight numerical check of the fused kernel.
    kparams_f32 = prepare_kernel_params(params, hidden_dim, matmul_dtype=jnp.float32)
    out_f32 = jax.block_until_ready(fwd(kparams_f32, x_candle, x_volume))
    assert out_f32.shape == (B, output_dim)
    assert jnp.allclose(out_f32, ref, rtol=1e-3, atol=1e-4), (out_f32, ref)

    # 2) bf16 MXU operands (recommended default on v5e/v6e/v7x): looser check
    #    because bf16 rounding compounds through the 8-step recurrence.
    kparams_bf16 = prepare_kernel_params(params, hidden_dim)   # bf16 default
    out_bf16 = jax.block_until_ready(fwd(kparams_bf16, x_candle, x_volume))
    assert out_bf16.shape == (B, output_dim)
    assert jnp.allclose(out_bf16, ref, rtol=5e-2, atol=5e-2), (out_bf16, ref)

    print("KERNEL_OK")
</pallas_src>

<mosaic_0001>
module attributes {stable_mosaic.version = 11 : i64} {
  func.func @candle_lstm_kernel(%arg0: i32, %arg1: memref<8x8x1xi32, #tpu.memory_space<vmem>>, %arg2: memref<8x8x1xf32, #tpu.memory_space<vmem>>, %arg3: memref<16x512xf32, #tpu.memory_space<vmem>>, %arg4: memref<1x512xf32, #tpu.memory_space<vmem>>, %arg5: memref<1x512xf32, #tpu.memory_space<vmem>>, %arg6: memref<128x512xf32, #tpu.memory_space<vmem>>, %arg7: memref<128x128xf32, #tpu.memory_space<vmem>>, %arg8: memref<1x128xf32, #tpu.memory_space<vmem>>, %arg9: memref<8x128xf32, #tpu.memory_space<vmem>>) attributes {dimension_semantics = [#tpu.dimension_semantics<parallel>], iteration_bounds = array<i64: 1>, scalar_prefetch = 0 : i64, scratch_operands = 0 : i64, tpu.core_type = #tpu.core_type<tc>, window_params = [{transform_indices = @transform_0, window_bounds = array<i64: 8, 8, 1>}, {transform_indices = @transform_1, window_bounds = array<i64: 8, 8, 1>}, {pipeline_mode = #tpu.pipeline_mode<synchronous>, transform_indices = @transform_2, window_bounds = array<i64: 16, 512>}, {pipeline_mode = #tpu.pipeline_mode<synchronous>, transform_indices = @transform_3, window_bounds = array<i64: 1, 512>}, {pipeline_mode = #tpu.pipeline_mode<synchronous>, transform_indices = @transform_4, window_bounds = array<i64: 1, 512>}, {pipeline_mode = #tpu.pipeline_mode<synchronous>, transform_indices = @transform_5, window_bounds = array<i64: 128, 512>}, {pipeline_mode = #tpu.pipeline_mode<synchronous>, transform_indices = @transform_6, window_bounds = array<i64: 128, 128>}, {pipeline_mode = #tpu.pipeline_mode<synchronous>, transform_indices = @transform_7, window_bounds = array<i64: 1, 128>}, {transform_indices = @transform_8, window_bounds = array<i64: 8, 128>}]} {
    %c0 = arith.constant 0 : index
    %c0_0 = arith.constant 0 : index
    %c0_1 = arith.constant 0 : index
    %0 = vector.load %arg1[%c0, %c0_0, %c0_1] : memref<8x8x1xi32, #tpu.memory_space<vmem>>, vector<8x8x1xi32>
    %1 = vector.shape_cast %0 : vector<8x8x1xi32> to vector<64x1xi32>
    %c0_2 = arith.constant 0 : index
    %c0_3 = arith.constant 0 : index
    %c0_4 = arith.constant 0 : index
    %2 = vector.load %arg2[%c0_2, %c0_3, %c0_4] : memref<8x8x1xf32, #tpu.memory_space<vmem>>, vector<8x8x1xf32>
    %3 = vector.shape_cast %2 : vector<8x8x1xf32> to vector<64x1xf32>
    %4 = tpu.iota {dimensions = array<i32: 1>} : vector<64x16xi32>
    %5 = vector.broadcast %1 : vector<64x1xi32> to vector<64x16xi32>
    %6 = arith.cmpi eq, %5, %4 : vector<64x16xi32>
    %7 = arith.extui %6 : vector<64x16xi1> to vector<64x16xi32>
    %8 = arith.sitofp %7 : vector<64x16xi32> to vector<64x16xf32>
    %c0_5 = arith.constant 0 : index
    %c0_6 = arith.constant 0 : index
    %9 = vector.load %arg3[%c0_5, %c0_6] : memref<16x512xf32, #tpu.memory_space<vmem>>, vector<16x512xf32>
    %cst = arith.constant dense<0.000000e+00> : vector<64x512xf32>
    %10 = tpu.matmul %8, %9, %cst {dimension_numbers = #tpu.dot_dimension_numbers<[1], [0], [0], [1], [0, 0, 1, 1], [], []>} : vector<64x16xf32>, vector<16x512xf32>, vector<64x512xf32> -> vector<64x512xf32>
    %c0_7 = arith.constant 0 : index
    %c0_8 = arith.constant 0 : index
    %11 = vector.load %arg4[%c0_7, %c0_8] : memref<1x512xf32, #tpu.memory_space<vmem>>, vector<1x512xf32>
    %12 = vector.broadcast %3 : vector<64x1xf32> to vector<64x512xf32>
    %13 = vector.broadcast %11 : vector<1x512xf32> to vector<64x512xf32>
    %14 = arith.mulf %12, %13 : vector<64x512xf32>
    %15 = arith.addf %10, %14 : vector<64x512xf32>
    %c0_9 = arith.constant 0 : index
    %c0_10 = arith.constant 0 : index
    %16 = vector.load %arg5[%c0_9, %c0_10] : memref<1x512xf32, #tpu.memory_space<vmem>>, vector<1x512xf32>
    %17 = vector.broadcast %16 : vector<1x512xf32> to vector<64x512xf32>
    %18 = arith.addf %15, %17 : vector<64x512xf32>
    %c0_11 = arith.constant 0 : index
    %c0_12 = arith.constant 0 : index
    %19 = vector.load %arg6[%c0_11, %c0_12] : memref<128x512xf32, #tpu.memory_space<vmem>>, vector<128x512xf32>
    %cst_13 = arith.constant 0.000000e+00 : f32
    %20 = vector.broadcast %cst_13 : f32 to vector<8x128xf32>
    %cst_14 = arith.constant 0.000000e+00 : f32
    %21 = vector.broadcast %cst_14 : f32 to vector<8x128xf32>
    %22 = vector.extract_strided_slice %18 {offsets = [0, 0], sizes = [8, 512], strides = [1, 1]} : vector<64x512xf32> to vector<8x512xf32>
    %cst_15 = arith.constant dense<0.000000e+00> : vector<8x512xf32>
    %23 = tpu.matmul %20, %19, %cst_15 {dimension_numbers = #tpu.dot_dimension_numbers<[1], [0], [0], [1], [0, 0, 1, 1], [], []>} : vector<8x128xf32>, vector<128x512xf32>, vector<8x512xf32> -> vector<8x512xf32>
    %24 = arith.addf %22, %23 : vector<8x512xf32>
    %25 = vector.extract_strided_slice %24 {offsets = [0, 0], sizes = [8, 128], strides = [1, 1]} : vector<8x512xf32> to vector<8x128xf32>
    %26 = arith.negf %25 : vector<8x128xf32>
    %27 = math.exp %26 : vector<8x128xf32>
    %cst_16 = arith.constant 1.000000e+00 : f32
    %28 = vector.broadcast %cst_16 : f32 to vector<8x128xf32>
    %29 = arith.addf %28, %27 : vector<8x128xf32>
    %30 = arith.divf %28, %29 : vector<8x128xf32>
    %31 = vector.extract_strided_slice %24 {offsets = [0, 128], sizes = [8, 128], strides = [1, 1]} : vector<8x512xf32> to vector<8x128xf32>
    %32 = arith.negf %31 : vector<8x128xf32>
    %33 = math.exp %32 : vector<8x128xf32>
    %cst_17 = arith.constant 1.000000e+00 : f32
    %34 = vector.broadcast %cst_17 : f32 to vector<8x128xf32>
    %35 = arith.addf %34, %33 : vector<8x128xf32>
    %36 = arith.divf %34, %35 : vector<8x128xf32>
    %37 = vector.extract_strided_slice %24 {offsets = [0, 256], sizes = [8, 128], strides = [1, 1]} : vector<8x512xf32> to vector<8x128xf32>
    %38 = math.tanh %37 : vector<8x128xf32>
    %39 = vector.extract_strided_slice %24 {offsets = [0, 384], sizes = [8, 128], strides = [1, 1]} : vector<8x512xf32> to vector<8x128xf32>
    %40 = arith.negf %39 : vector<8x128xf32>
    %41 = math.exp %40 : vector<8x128xf32>
    %cst_18 = arith.constant 1.000000e+00 : f32
    %42 = vector.broadcast %cst_18 : f32 to vector<8x128xf32>
    %43 = arith.addf %42, %41 : vector<8x128xf32>
    %44 = arith.divf %42, %43 : vector<8x128xf32>
    %45 = arith.mulf %36, %21 : vector<8x128xf32>
    %46 = arith.mulf %30, %38 : vector<8x128xf32>
    %47 = arith.addf %45, %46 : vector<8x128xf32>
    %48 = math.tanh %47 : vector<8x128xf32>
    %49 = arith.mulf %44, %48 : vector<8x128xf32>
    %50 = vector.extract_strided_slice %18 {offsets = [8, 0], sizes = [8, 512], strides = [1, 1]} : vector<64x512xf32> to vector<8x512xf32>
    %cst_19 = arith.constant dense<0.000000e+00> : vector<8x512xf32>
    %51 = tpu.matmul %49, %19, %cst_19 {dimension_numbers = #tpu.dot_dimension_numbers<[1], [0], [0], [1], [0, 0, 1, 1], [], []>} : vector<8x128xf32>, vector<128x512xf32>, vector<8x512xf32> -> vector<8x512xf32>
    %52 = arith.addf %50, %51 : vector<8x512xf32>
    %53 = vector.extract_strided_slice %52 {offsets = [0, 0], sizes = [8, 128], strides = [1, 1]} : vector<8x512xf32> to vector<8x128xf32>
    %54 = arith.negf %53 : vector<8x128xf32>
    %55 = math.exp %54 : vector<8x128xf32>
    %cst_20 = arith.constant 1.000000e+00 : f32
    %56 = vector.broadcast %cst_20 : f32 to vector<8x128xf32>
    %57 = arith.addf %56, %55 : vector<8x128xf32>
    %58 = arith.divf %56, %57 : vector<8x128xf32>
    %59 = vector.extract_strided_slice %52 {offsets = [0, 128], sizes = [8, 128], strides = [1, 1]} : vector<8x512xf32> to vector<8x128xf32>
    %60 = arith.negf %59 : vector<8x128xf32>
    %61 = math.exp %60 : vector<8x128xf32>
    %cst_21 = arith.constant 1.000000e+00 : f32
    %62 = vector.broadcast %cst_21 : f32 to vector<8x128xf32>
    %63 = arith.addf %62, %61 : vector<8x128xf32>
    %64 = arith.divf %62, %63 : vector<8x128xf32>
    %65 = vector.extract_strided_slice %52 {offsets = [0, 256], sizes = [8, 128], strides = [1, 1]} : vector<8x512xf32> to vector<8x128xf32>
    %66 = math.tanh %65 : vector<8x128xf32>
    %67 = vector.extract_strided_slice %52 {offsets = [0, 384], sizes = [8, 128], strides = [1, 1]} : vector<8x512xf32> to vector<8x128xf32>
    %68 = arith.negf %67 : vector<8x128xf32>
    %69 = math.exp %68 : vector<8x128xf32>
    %cst_22 = arith.constant 1.000000e+00 : f32
    %70 = vector.broadcast %cst_22 : f32 to vector<8x128xf32>
    %71 = arith.addf %70, %69 : vector<8x128xf32>
    %72 = arith.divf %70, %71 : vector<8x128xf32>
    %73 = arith.mulf %64, %47 : vector<8x128xf32>
    %74 = arith.mulf %58, %66 : vector<8x128xf32>
    %75 = arith.addf %73, %74 : vector<8x128xf32>
    %76 = math.tanh %75 : vector<8x128xf32>
    %77 = arith.mulf %72, %76 : vector<8x128xf32>
    %78 = vector.extract_strided_slice %18 {offsets = [16, 0], sizes = [8, 512], strides = [1, 1]} : vector<64x512xf32> to vector<8x512xf32>
    %cst_23 = arith.constant dense<0.000000e+00> : vector<8x512xf32>
    %79 = tpu.matmul %77, %19, %cst_23 {dimension_numbers = #tpu.dot_dimension_numbers<[1], [0], [0], [1], [0, 0, 1, 1], [], []>} : vector<8x128xf32>, vector<128x512xf32>, vector<8x512xf32> -> vector<8x512xf32>
    %80 = arith.addf %78, %79 : vector<8x512xf32>
    %81 = vector.extract_strided_slice %80 {offsets = [0, 0], sizes = [8, 128], strides = [1, 1]} : vector<8x512xf32> to vector<8x128xf32>
    %82 = arith.negf %81 : vector<8x128xf32>
    %83 = math.exp %82 : vector<8x128xf32>
    %cst_24 = arith.constant 1.000000e+00 : f32
    %84 = vector.broadcast %cst_24 : f32 to vector<8x128xf32>
    %85 = arith.addf %84, %83 : vector<8x128xf32>
    %86 = arith.divf %84, %85 : vector<8x128xf32>
    %87 = vector.extract_strided_slice %80 {offsets = [0, 128], sizes = [8, 128], strides = [1, 1]} : vector<8x512xf32> to vector<8x128xf32>
    %88 = arith.negf %87 : vector<8x128xf32>
    %89 = math.exp %88 : vector<8x128xf32>
    %cst_25 = arith.constant 1.000000e+00 : f32
    %90 = vector.broadcast %cst_25 : f32 to vector<8x128xf32>
    %91 = arith.addf %90, %89 : vector<8x128xf32>
    %92 = arith.divf %90, %91 : vector<8x128xf32>
    %93 = vector.extract_strided_slice %80 {offsets = [0, 256], sizes = [8, 128], strides = [1, 1]} : vector<8x512xf32> to vector<8x128xf32>
    %94 = math.tanh %93 : vector<8x128xf32>
    %95 = vector.extract_strided_slice %80 {offsets = [0, 384], sizes = [8, 128], strides = [1, 1]} : vector<8x512xf32> to vector<8x128xf32>
    %96 = arith.negf %95 : vector<8x128xf32>
    %97 = math.exp %96 : vector<8x128xf32>
    %cst_26 = arith.constant 1.000000e+00 : f32
    %98 = vector.broadcast %cst_26 : f32 to vector<8x128xf32>
    %99 = arith.addf %98, %97 : vector<8x128xf32>
    %100 = arith.divf %98, %99 : vector<8x128xf32>
    %101 = arith.mulf %92, %75 : vector<8x128xf32>
    %102 = arith.mulf %86, %94 : vector<8x128xf32>
    %103 = arith.addf %101, %102 : vector<8x128xf32>
    %104 = math.tanh %103 : vector<8x128xf32>
    %105 = arith.mulf %100, %104 : vector<8x128xf32>
    %106 = vector.extract_strided_slice %18 {offsets = [24, 0], sizes = [8, 512], strides = [1, 1]} : vector<64x512xf32> to vector<8x512xf32>
    %cst_27 = arith.constant dense<0.000000e+00> : vector<8x512xf32>
    %107 = tpu.matmul %105, %19, %cst_27 {dimension_numbers = #tpu.dot_dimension_numbers<[1], [0], [0], [1], [0, 0, 1, 1], [], []>} : vector<8x128xf32>, vector<128x512xf32>, vector<8x512xf32> -> vector<8x512xf32>
    %108 = arith.addf %106, %107 : vector<8x512xf32>
    %109 = vector.extract_strided_slice %108 {offsets = [0, 0], sizes = [8, 128], strides = [1, 1]} : vector<8x512xf32> to vector<8x128xf32>
    %110 = arith.negf %109 : vector<8x128xf32>
    %111 = math.exp %110 : vector<8x128xf32>
    %cst_28 = arith.constant 1.000000e+00 : f32
    %112 = vector.broadcast %cst_28 : f32 to vector<8x128xf32>
    %113 = arith.addf %112, %111 : vector<8x128xf32>
    %114 = arith.divf %112, %113 : vector<8x128xf32>
    %115 = vector.extract_strided_slice %108 {offsets = [0, 128], sizes = [8, 128], strides = [1, 1]} : vector<8x512xf32> to vector<8x128xf32>
    %116 = arith.negf %115 : vector<8x128xf32>
    %117 = math.exp %116 : vector<8x128xf32>
    %cst_29 = arith.constant 1.000000e+00 : f32
    %118 = vector.broadcast %cst_29 : f32 to vector<8x128xf32>
    %119 = arith.addf %118, %117 : vector<8x128xf32>
    %120 = arith.divf %118, %119 : vector<8x128xf32>
    %121 = vector.extract_strided_slice %108 {offsets = [0, 256], sizes = [8, 128], strides = [1, 1]} : vector<8x512xf32> to vector<8x128xf32>
    %122 = math.tanh %121 : vector<8x128xf32>
    %123 = vector.extract_strided_slice %108 {offsets = [0, 384], sizes = [8, 128], strides = [1, 1]} : vector<8x512xf32> to vector<8x128xf32>
    %124 = arith.negf %123 : vector<8x128xf32>
    %125 = math.exp %124 : vector<8x128xf32>
    %cst_30 = arith.constant 1.000000e+00 : f32
    %126 = vector.broadcast %cst_30 : f32 to vector<8x128xf32>
    %127 = arith.addf %126, %125 : vector<8x128xf32>
    %128 = arith.divf %126, %127 : vector<8x128xf32>
    %129 = arith.mulf %120, %103 : vector<8x128xf32>
    %130 = arith.mulf %114, %122 : vector<8x128xf32>
    %131 = arith.addf %129, %130 : vector<8x128xf32>
    %132 = math.tanh %131 : vector<8x128xf32>
    %133 = arith.mulf %128, %132 : vector<8x128xf32>
    %134 = vector.extract_strided_slice %18 {offsets = [32, 0], sizes = [8, 512], strides = [1, 1]} : vector<64x512xf32> to vector<8x512xf32>
    %cst_31 = arith.constant dense<0.000000e+00> : vector<8x512xf32>
    %135 = tpu.matmul %133, %19, %cst_31 {dimension_numbers = #tpu.dot_dimension_numbers<[1], [0], [0], [1], [0, 0, 1, 1], [], []>} : vector<8x128xf32>, vector<128x512xf32>, vector<8x512xf32> -> vector<8x512xf32>
    %136 = arith.addf %134, %135 : vector<8x512xf32>
    %137 = vector.extract_strided_slice %136 {offsets = [0, 0], sizes = [8, 128], strides = [1, 1]} : vector<8x512xf32> to vector<8x128xf32>
    %138 = arith.negf %137 : vector<8x128xf32>
    %139 = math.exp %138 : vector<8x128xf32>
    %cst_32 = arith.constant 1.000000e+00 : f32
    %140 = vector.broadcast %cst_32 : f32 to vector<8x128xf32>
    %141 = arith.addf %140, %139 : vector<8x128xf32>
    %142 = arith.divf %140, %141 : vector<8x128xf32>
    %143 = vector.extract_strided_slice %136 {offsets = [0, 128], sizes = [8, 128], strides = [1, 1]} : vector<8x512xf32> to vector<8x128xf32>
    %144 = arith.negf %143 : vector<8x128xf32>
    %145 = math.exp %144 : vector<8x128xf32>
    %cst_33 = arith.constant 1.000000e+00 : f32
    %146 = vector.broadcast %cst_33 : f32 to vector<8x128xf32>
    %147 = arith.addf %146, %145 : vector<8x128xf32>
    %148 = arith.divf %146, %147 : vector<8x128xf32>
    %149 = vector.extract_strided_slice %136 {offsets = [0, 256], sizes = [8, 128], strides = [1, 1]} : vector<8x512xf32> to vector<8x128xf32>
    %150 = math.tanh %149 : vector<8x128xf32>
    %151 = vector.extract_strided_slice %136 {offsets = [0, 384], sizes = [8, 128], strides = [1, 1]} : vector<8x512xf32> to vector<8x128xf32>
    %152 = arith.negf %151 : vector<8x128xf32>
    %153 = math.exp %152 : vector<8x128xf32>
    %cst_34 = arith.constant 1.000000e+00 : f32
    %154 = vector.broadcast %cst_34 : f32 to vector<8x128xf32>
    %155 = arith.addf %154, %153 : vector<8x128xf32>
    %156 = arith.divf %154, %155 : vector<8x128xf32>
    %157 = arith.mulf %148, %131 : vector<8x128xf32>
    %158 = arith.mulf %142, %150 : vector<8x128xf32>
    %159 = arith.addf %157, %158 : vector<8x128xf32>
    %160 = math.tanh %159 : vector<8x128xf32>
    %161 = arith.mulf %156, %160 : vector<8x128xf32>
    %162 = vector.extract_strided_slice %18 {offsets = [40, 0], sizes = [8, 512], strides = [1, 1]} : vector<64x512xf32> to vector<8x512xf32>
    %cst_35 = arith.constant dense<0.000000e+00> : vector<8x512xf32>
    %163 = tpu.matmul %161, %19, %cst_35 {dimension_numbers = #tpu.dot_dimension_numbers<[1], [0], [0], [1], [0, 0, 1, 1], [], []>} : vector<8x128xf32>, vector<128x512xf32>, vector<8x512xf32> -> vector<8x512xf32>
    %164 = arith.addf %162, %163 : vector<8x512xf32>
    %165 = vector.extract_strided_slice %164 {offsets = [0, 0], sizes = [8, 128], strides = [1, 1]} : vector<8x512xf32> to vector<8x128xf32>
    %166 = arith.negf %165 : vector<8x128xf32>
    %167 = math.exp %166 : vector<8x128xf32>
    %cst_36 = arith.constant 1.000000e+00 : f32
    %168 = vector.broadcast %cst_36 : f32 to vector<8x128xf32>
    %169 = arith.addf %168, %167 : vector<8x128xf32>
    %170 = arith.divf %168, %169 : vector<8x128xf32>
    %171 = vector.extract_strided_slice %164 {offsets = [0, 128], sizes = [8, 128], strides = [1, 1]} : vector<8x512xf32> to vector<8x128xf32>
    %172 = arith.negf %171 : vector<8x128xf32>
    %173 = math.exp %172 : vector<8x128xf32>
    %cst_37 = arith.constant 1.000000e+00 : f32
    %174 = vector.broadcast %cst_37 : f32 to vector<8x128xf32>
    %175 = arith.addf %174, %173 : vector<8x128xf32>
    %176 = arith.divf %174, %175 : vector<8x128xf32>
    %177 = vector.extract_strided_slice %164 {offsets = [0, 256], sizes = [8, 128], strides = [1, 1]} : vector<8x512xf32> to vector<8x128xf32>
    %178 = math.tanh %177 : vector<8x128xf32>
    %179 = vector.extract_strided_slice %164 {offsets = [0, 384], sizes = [8, 128], strides = [1, 1]} : vector<8x512xf32> to vector<8x128xf32>
    %180 = arith.negf %179 : vector<8x128xf32>
    %181 = math.exp %180 : vector<8x128xf32>
    %cst_38 = arith.constant 1.000000e+00 : f32
    %182 = vector.broadcast %cst_38 : f32 to vector<8x128xf32>
    %183 = arith.addf %182, %181 : vector<8x128xf32>
    %184 = arith.divf %182, %183 : vector<8x128xf32>
    %185 = arith.mulf %176, %159 : vector<8x128xf32>
    %186 = arith.mulf %170, %178 : vector<8x128xf32>
    %187 = arith.addf %185, %186 : vector<8x128xf32>
    %188 = math.tanh %187 : vector<8x128xf32>
    %189 = arith.mulf %184, %188 : vector<8x128xf32>
    %190 = vector.extract_strided_slice %18 {offsets = [48, 0], sizes = [8, 512], strides = [1, 1]} : vector<64x512xf32> to vector<8x512xf32>
    %cst_39 = arith.constant dense<0.000000e+00> : vector<8x512xf32>
    %191 = tpu.matmul %189, %19, %cst_39 {dimension_numbers = #tpu.dot_dimension_numbers<[1], [0], [0], [1], [0, 0, 1, 1], [], []>} : vector<8x128xf32>, vector<128x512xf32>, vector<8x512xf32> -> vector<8x512xf32>
    %192 = arith.addf %190, %191 : vector<8x512xf32>
    %193 = vector.extract_strided_slice %192 {offsets = [0, 0], sizes = [8, 128], strides = [1, 1]} : vector<8x512xf32> to vector<8x128xf32>
    %194 = arith.negf %193 : vector<8x128xf32>
    %195 = math.exp %194 : vector<8x128xf32>
    %cst_40 = arith.constant 1.000000e+00 : f32
    %196 = vector.broadcast %cst_40 : f32 to vector<8x128xf32>
    %197 = arith.addf %196, %195 : vector<8x128xf32>
    %198 = arith.divf %196, %197 : vector<8x128xf32>
    %199 = vector.extract_strided_slice %192 {offsets = [0, 128], sizes = [8, 128], strides = [1, 1]} : vector<8x512xf32> to vector<8x128xf32>
    %200 = arith.negf %199 : vector<8x128xf32>
    %201 = math.exp %200 : vector<8x128xf32>
    %cst_41 = arith.constant 1.000000e+00 : f32
    %202 = vector.broadcast %cst_41 : f32 to vector<8x128xf32>
    %203 = arith.addf %202, %201 : vector<8x128xf32>
    %204 = arith.divf %202, %203 : vector<8x128xf32>
    %205 = vector.extract_strided_slice %192 {offsets = [0, 256], sizes = [8, 128], strides = [1, 1]} : vector<8x512xf32> to vector<8x128xf32>
    %206 = math.tanh %205 : vector<8x128xf32>
    %207 = vector.extract_strided_slice %192 {offsets = [0, 384], sizes = [8, 128], strides = [1, 1]} : vector<8x512xf32> to vector<8x128xf32>
    %208 = arith.negf %207 : vector<8x128xf32>
    %209 = math.exp %208 : vector<8x128xf32>
    %cst_42 = arith.constant 1.000000e+00 : f32
    %210 = vector.broadcast %cst_42 : f32 to vector<8x128xf32>
    %211 = arith.addf %210, %209 : vector<8x128xf32>
    %212 = arith.divf %210, %211 : vector<8x128xf32>
    %213 = arith.mulf %204, %187 : vector<8x128xf32>
    %214 = arith.mulf %198, %206 : vector<8x128xf32>
    %215 = arith.addf %213, %214 : vector<8x128xf32>
    %216 = math.tanh %215 : vector<8x128xf32>
    %217 = arith.mulf %212, %216 : vector<8x128xf32>
    %218 = vector.extract_strided_slice %18 {offsets = [56, 0], sizes = [8, 512], strides = [1, 1]} : vector<64x512xf32> to vector<8x512xf32>
    %cst_43 = arith.constant dense<0.000000e+00> : vector<8x512xf32>
    %219 = tpu.matmul %217, %19, %cst_43 {dimension_numbers = #tpu.dot_dimension_numbers<[1], [0], [0], [1], [0, 0, 1, 1], [], []>} : vector<8x128xf32>, vector<128x512xf32>, vector<8x512xf32> -> vector<8x512xf32>
    %220 = arith.addf %218, %219 : vector<8x512xf32>
    %221 = vector.extract_strided_slice %220 {offsets = [0, 0], sizes = [8, 128], strides = [1, 1]} : vector<8x512xf32> to vector<8x128xf32>
    %222 = arith.negf %221 : vector<8x128xf32>
    %223 = math.exp %222 : vector<8x128xf32>
    %cst_44 = arith.constant 1.000000e+00 : f32
    %224 = vector.broadcast %cst_44 : f32 to vector<8x128xf32>
    %225 = arith.addf %224, %223 : vector<8x128xf32>
    %226 = arith.divf %224, %225 : vector<8x128xf32>
    %227 = vector.extract_strided_slice %220 {offsets = [0, 128], sizes = [8, 128], strides = [1, 1]} : vector<8x512xf32> to vector<8x128xf32>
    %228 = arith.negf %227 : vector<8x128xf32>
    %229 = math.exp %228 : vector<8x128xf32>
    %cst_45 = arith.constant 1.000000e+00 : f32
    %230 = vector.broadcast %cst_45 : f32 to vector<8x128xf32>
    %231 = arith.addf %230, %229 : vector<8x128xf32>
    %232 = arith.divf %230, %231 : vector<8x128xf32>
    %233 = vector.extract_strided_slice %220 {offsets = [0, 256], sizes = [8, 128], strides = [1, 1]} : vector<8x512xf32> to vector<8x128xf32>
    %234 = math.tanh %233 : vector<8x128xf32>
    %235 = vector.extract_strided_slice %220 {offsets = [0, 384], sizes = [8, 128], strides = [1, 1]} : vector<8x512xf32> to vector<8x128xf32>
    %236 = arith.negf %235 : vector<8x128xf32>
    %237 = math.exp %236 : vector<8x128xf32>
    %cst_46 = arith.constant 1.000000e+00 : f32
    %238 = vector.broadcast %cst_46 : f32 to vector<8x128xf32>
    %239 = arith.addf %238, %237 : vector<8x128xf32>
    %240 = arith.divf %238, %239 : vector<8x128xf32>
    %241 = arith.mulf %232, %215 : vector<8x128xf32>
    %242 = arith.mulf %226, %234 : vector<8x128xf32>
    %243 = arith.addf %241, %242 : vector<8x128xf32>
    %244 = math.tanh %243 : vector<8x128xf32>
    %245 = arith.mulf %240, %244 : vector<8x128xf32>
    %c0_47 = arith.constant 0 : index
    %c0_48 = arith.constant 0 : index
    %246 = vector.load %arg7[%c0_47, %c0_48] : memref<128x128xf32, #tpu.memory_space<vmem>>, vector<128x128xf32>
    %cst_49 = arith.constant dense<0.000000e+00> : vector<8x128xf32>
    %247 = tpu.matmul %245, %246, %cst_49 {dimension_numbers = #tpu.dot_dimension_numbers<[1], [0], [0], [1], [0, 0, 1, 1], [], []>} : vector<8x128xf32>, vector<128x128xf32>, vector<8x128xf32> -> vector<8x128xf32>
    %c0_50 = arith.constant 0 : index
    %c0_51 = arith.constant 0 : index
    %248 = vector.load %arg8[%c0_50, %c0_51] : memref<1x128xf32, #tpu.memory_space<vmem>>, vector<1x128xf32>
    %249 = vector.broadcast %248 : vector<1x128xf32> to vector<8x128xf32>
    %250 = arith.addf %247, %249 : vector<8x128xf32>
    %251 = arith.negf %250 : vector<8x128xf32>
    %252 = math.exp %251 : vector<8x128xf32>
    %cst_52 = arith.constant 1.000000e+00 : f32
    %253 = vector.broadcast %cst_52 : f32 to vector<8x128xf32>
    %254 = arith.addf %253, %252 : vector<8x128xf32>
    %255 = arith.divf %253, %254 : vector<8x128xf32>
    %c0_53 = arith.constant 0 : index
    %c0_54 = arith.constant 0 : index
    %256 = vector.load %arg9[%c0_53, %c0_54] : memref<8x128xf32, #tpu.memory_space<vmem>>, vector<8x128xf32>
    tpu.vector_store %arg9[%c0_53, %c0_54], %255 {strides = array<i32>} : memref<8x128xf32, #tpu.memory_space<vmem>>, vector<8x128xf32>,
    return
  }
  func.func @transform_0(%arg0: i32) -> (i32, i32, i32) {
    %c0_i32 = arith.constant 0 : i32
    %c0_i32_0 = arith.constant 0 : i32
    %c0_i32_1 = arith.constant 0 : i32
    return %c0_i32, %arg0, %c0_i32_0 : i32, i32, i32
  }
  func.func @transform_1(%arg0: i32) -> (i32, i32, i32) {
    %c0_i32 = arith.constant 0 : i32
    %c0_i32_0 = arith.constant 0 : i32
    %c0_i32_1 = arith.constant 0 : i32
    return %c0_i32, %arg0, %c0_i32_0 : i32, i32, i32
  }
  func.func @transform_2(%arg0: i32) -> (i32, i32) {
    %c0_i32 = arith.constant 0 : i32
    %c0_i32_0 = arith.constant 0 : i32
    %c0_i32_1 = arith.constant 0 : i32
    return %c0_i32, %c0_i32_0 : i32, i32
  }
  func.func @transform_3(%arg0: i32) -> (i32, i32) {
    %c0_i32 = arith.constant 0 : i32
    %c0_i32_0 = arith.constant 0 : i32
    %c0_i32_1 = arith.constant 0 : i32
    return %c0_i32, %c0_i32_0 : i32, i32
  }
  func.func @transform_4(%arg0: i32) -> (i32, i32) {
    %c0_i32 = arith.constant 0 : i32
    %c0_i32_0 = arith.constant 0 : i32
    %c0_i32_1 = arith.constant 0 : i32
    return %c0_i32, %c0_i32_0 : i32, i32
  }
  func.func @transform_5(%arg0: i32) -> (i32, i32) {
    %c0_i32 = arith.constant 0 : i32
    %c0_i32_0 = arith.constant 0 : i32
    %c0_i32_1 = arith.constant 0 : i32
    return %c0_i32, %c0_i32_0 : i32, i32
  }
  func.func @transform_6(%arg0: i32) -> (i32, i32) {
    %c0_i32 = arith.constant 0 : i32
    %c0_i32_0 = arith.constant 0 : i32
    %c0_i32_1 = arith.constant 0 : i32
    return %c0_i32, %c0_i32_0 : i32, i32
  }
  func.func @transform_7(%arg0: i32) -> (i32, i32) {
    %c0_i32 = arith.constant 0 : i32
    %c0_i32_0 = arith.constant 0 : i32
    %c0_i32_1 = arith.constant 0 : i32
    return %c0_i32, %c0_i32_0 : i32, i32
  }
  func.func @transform_8(%arg0: i32) -> (i32, i32) {
    %c0_i32 = arith.constant 0 : i32
    %c0_i32_0 = arith.constant 0 : i32
    return %arg0, %c0_i32 : i32, i32
  }
}

</mosaic_0001>

<bundles_post_ra>
// kernel: candle_lstm_forward.1
= control target key start
LH: loop header
LB: loop body
LE: loop exit
PB: predicated region body
PF: predicated region fallthrough
CT: control target
= control target key end

     0   :  { %13 = vsyncpa [#allocation3], 0  ;;  %s2373_s27 = smov [#allocation2]   ;;  %s3624_s0 = inlined_call_operand.vmem [shape: s32[8,8,1], index: 0, kind: input, shape index: {}]   ;;  %s3625_s1 = inlined_call_operand.vmem [shape: f32[8,8,1], index: 1, kind: input, shape index: {}]   ;;  %s3626_s2 = inlined_call_operand.vmem [shape: f32[16,512], index: 2, kind: input, shape index: {}]   ;;  %s3627_s3 = inlined_call_operand.vmem [shape: f32[1,512], index: 3, kind: input, shape index: {}]   ;;  %s3628_s4 = inlined_call_operand.vmem [shape: f32[1,512], index: 4, kind: input, shape index: {}]   ;;  %s3629_s5 = inlined_call_operand.hbm [shape: f32[128,512], index: 5, kind: input, shape index: {}]   ;;  %s3630_s6 = inlined_call_operand.vmem [shape: f32[128,128], index: 6, kind: input, shape index: {}]   ;;  %s3631_s7 = inlined_call_operand.vmem [shape: f32[1,128], index: 7, kind: input, shape index: {}]   ;;  %s3632_s8 = inlined_call_operand.vmem [shape: f32[8,128], index: 8, kind: output, shape index: {}]  }
   0x1   :  { %s29_s28 = sshll.u32 %s2373_s27, 4  ;;  %s30_s28 = int_to_ptr.vmem [resolvable:$true] %s29_s28 }
   0x2   :  { %s2359_s29 = scalar_lea.vmem %s30_s28, 8192  ;;  %p2364_p1 = scmp.lt.s32.totalorder %s30_s28, %s30_s28 }
   0x3   :  { %p2360_p0 = scmp.ne.s32.totalorder %s30_s28, %s2359_s29  ;;  %p2365_p2 = scmp.lt.s32.totalorder %s2359_s29, %s2359_s29 }
   0x5   :  { %p2366_p3 = por %p2365_p2, %p2364_p1 }
   0x7   :  { %p2367_p4 = pnand %p2366_p3, %p2360_p0 }
   0x9   :  { %2370 = shalt.err (!%p2367_p4)
}
   0xa   :  { %s2374_s30 = smov 512   ;;  %s2375_s9 = smov 32  }
   0xb   :  { %35 = dma.hbm_to_vmem [thread:$0]  %s3629_s5, 8192, %s30_s28, [#allocation3], %s2374_s30, %s2374_s30, %s2375_s9  }
   0xc   :  { %2371 = dma.done.wait [#allocation3], 8192  }
   0xd   :  { %2372 = vsyncadd [#allocation3], 4294959104  ;;  %v2376_v0 = vmov 0   ;;  %v3636_v1 = vmov 0.0   ;;  %v45_v2 = vld [vmem:[%s3624_s0 + $0x10] sm:$0xff]  ;;  %v43_v3 = vld [vmem:[%s3624_s0] sm:$0xff]  ;;  %v3633_v28 = vlaneseq }
   0xe   :  { %2154 = vset.pattern.permute.xlu1 %v2376_v0  ;;  %2153 = vset.pattern.permute.xlu0 %v2376_v0  ;;  %v46_v4 = vld [vmem:[%s3624_s0 + $0x18] sm:$0xff]  ;;  %v44_v5 = vld [vmem:[%s3624_s0 + $0x8] sm:$0xff]  ;;  %v47_v7 = vld [vmem:[%s3624_s0 + $0x20] sm:$0xff]  ;;  %vm211_vm0 = vcmask 130048   ;;  %vm2378_vm9 = vmmov 0  }
   0xf   :  { %300 = vmatprep.mubr.f32.mxu0 %v3636_v1  ;;  %413 = vmatprep.mubr.f32.mxu1 %v3636_v1  ;;  %v48_v6 = vld [vmem:[%s3624_s0 + $0x28] sm:$0xff]  ;;  %v113_v9 = vld [vmem:[%s3626_s2 + $0x20] sm:$0xff]  ;;  %v116_v10 = vld [vmem:[%s3626_s2 + $0x38] sm:$0xff]  ;;  %v2508_v29 = vand.u32 127, %v3633_v28 }
  0x10   :  { %68 = vperm.xlu1 %2154, %v45_v2   ;;  %62 = vperm.xlu0 %2153, %v43_v3   ;;  %v114_v8 = vld [vmem:[%s3626_s2 + $0x28] sm:$0xff]  ;;  %v115_v12 = vld [vmem:[%s3626_s2 + $0x30] sm:$0xff]  ;;  %v109_v13 = vld [vmem:[%s3626_s2] sm:$0xff] }
  0x11   :  { %264 = vmatprep.subr.mxu0 %v114_v8  ;;  %v110_v11 = vld [vmem:[%s3626_s2 + $0x8] sm:$0xff]  ;;  %377 = vmatprep.subr.mxu1 %v116_v10  ;;  %v112_v14 = vld [vmem:[%s3626_s2 + $0x18] sm:$0xff]  ;;  %v111_v15 = vld [vmem:[%s3626_s2 + $0x10] sm:$0xff] }
  0x12   :  { %265 = vmatpush1.msra.mxu0 %v113_v9  ;;  %378 = vmatpush1.msra.mxu1 %v115_v12  ;;  %v2471_v16 = vld [vmem:[#allocation2 + $0x1e8] sm:$0xff]  ;;  %v2473_v17 = vld [vmem:[#allocation2 + $0x1f8] sm:$0xff]  ;;  %v49_v19 = vld [vmem:[%s3624_s0 + $0x30] sm:$0xff] }
  0x13   :  { %266 = vmatprep.subr.mxu0 %v110_v11  ;;  %v50_v18 = vld [vmem:[%s3624_s0 + $0x38] sm:$0xff]  ;;  %379 = vmatprep.subr.mxu1 %v112_v14  ;;  %v52_v20 = vld [vmem:[%s3625_s1 + $0x8] sm:$0xff]  ;;  %v51_v21 = vld [vmem:[%s3625_s1] sm:$0xff] }
  0x14   :  { %71 = vperm.xlu1 %2154, %v46_v4   ;;  %65 = vperm.xlu0 %2153, %v44_v5   ;;  %v54_v22 = vld [vmem:[%s3625_s1 + $0x18] sm:$0xff]  ;;  %v53_v23 = vld [vmem:[%s3625_s1 + $0x10] sm:$0xff]  ;;  %v56_v24 = vld [vmem:[%s3625_s1 + $0x28] sm:$0xff] }
  0x15   :  { %267 = vmatpush1.msra.mxu0 %v109_v13  ;;  %380 = vmatpush1.msra.mxu1 %v111_v15  ;;  %v55_v25 = vld [vmem:[%s3625_s1 + $0x20] sm:$0xff]  ;;  %v58_v26 = vld [vmem:[%s3625_s1 + $0x38] sm:$0xff]  ;;  %v57_v27 = vld [vmem:[%s3625_s1 + $0x30] sm:$0xff] }
  0x16   :  { %580 = vmatprep.subr.mxu0 %v2471_v16  ;;  %651 = vmatprep.subr.mxu1 %v2473_v17  ;;  %v2511_v31 = vld [vmem:[#allocation2 + $0x1e0] sm:$0xff]  ;;  %v2513_v32 = vld [vmem:[#allocation2 + $0x1f0] sm:$0xff]  ;;  %v2516_v34 = vld [vmem:[#allocation2 + $0x1c8] sm:$0xff] }
  0x17   :  { %v2518_v35 = vld [vmem:[#allocation2 + $0x1d8] sm:$0xff]  ;;  %v2522_v36 = vld [vmem:[#allocation2 + $0x1c0] sm:$0xff]  ;;  %v2526_v38 = vld [vmem:[#allocation2 + $0x1a8] sm:$0xff] }
  0x18   :  { %77 = vperm.xlu1 %2154, %v48_v6   ;;  %74 = vperm.xlu0 %2153, %v47_v7   ;;  %v2531_v39 = vld [vmem:[#allocation2 + $0x1d0] sm:$0xff]  ;;  %v2536_v41 = vld [vmem:[#allocation2 + $0x1a0] sm:$0xff]  ;;  %v2540_v43 = vld [vmem:[#allocation2 + $0x1b8] sm:$0xff] }
  0x19   :  { %v2542_v44 = vld [vmem:[#allocation2 + $0x188] sm:$0xff]  ;;  %v2547_v45 = vld [vmem:[#allocation2 + $0x1b0] sm:$0xff]  ;;  %v2549_v46 = vld [vmem:[#allocation2 + $0x180] sm:$0xff] }
  0x1a   :  { %v2553_v47 = vld [vmem:[#allocation2 + $0x198] sm:$0xff]  ;;  %v2557_v48 = vld [vmem:[#allocation2 + $0x168] sm:$0xff]  ;;  %v2562_v50 = vld [vmem:[#allocation2 + $0x190] sm:$0xff] }
  0x1b   :  { %v2566_v51 = vld [vmem:[#allocation2 + $0x160] sm:$0xff]  ;;  %v2570_v52 = vld [vmem:[#allocation2 + $0x178] sm:$0xff]  ;;  %v2572_v53 = vld [vmem:[#allocation2 + $0x148] sm:$0xff] }
  0x1c   :  { %83 = vperm.xlu1 %2154, %v50_v18   ;;  %80 = vperm.xlu0 %2153, %v49_v19   ;;  %v2576_v54 = vld [vmem:[#allocation2 + $0x170] sm:$0xff]  ;;  %v2578_v55 = vld [vmem:[#allocation2 + $0x140] sm:$0xff]  ;;  %v2582_v57 = vld [vmem:[#allocation2 + $0x158] sm:$0xff] }
  0x1d   :  { %v2587_v58 = vld [vmem:[#allocation2 + $0x128] sm:$0xff]  ;;  %v2591_v59 = vld [vmem:[#allocation2 + $0x150] sm:$0xff]  ;;  %v2595_v60 = vld [vmem:[#allocation2 + $0x120] sm:$0xff] }
  0x1e   :  { %v2600_v63 = vld [vmem:[#allocation2 + $0x138] sm:$0xff]  ;;  %v2602_v0 = vld [vmem:[#allocation2 + $0x108] sm:$0xff]  ;;  %v2606_v2 = vld [vmem:[#allocation2 + $0x130] sm:$0xff] }
  0x1f   :  { %v2608_v3 = vld [vmem:[#allocation2 + $0x100] sm:$0xff]  ;;  %v2612_v4 = vld [vmem:[#allocation2 + $0x118] sm:$0xff]  ;;  %v2617_v5 = vld [vmem:[#allocation2 + $0xe8] sm:$0xff] }
  0x20   :  { %125 = vperm.xlu1 %2154, %v52_v20   ;;  %120 = vperm.xlu0 %2153, %v51_v21   ;;  %v2621_v6 = vld [vmem:[#allocation2 + $0x110] sm:$0xff]  ;;  %v2625_v7 = vld [vmem:[#allocation2 + $0xe0] sm:$0xff]  ;;  %v2630_v10 = vld [vmem:[#allocation2 + $0xf8] sm:$0xff] }
  0x21   :  { %v2632_v11 = vld [vmem:[#allocation2 + $0xc8] sm:$0xff]  ;;  %v2636_v12 = vld [vmem:[#allocation2 + $0xf0] sm:$0xff]  ;;  %v2638_v13 = vld [vmem:[#allocation2 + $0xc0] sm:$0xff] }
  0x22   :  { %3739 = vst [vmem:[#allocation5_spill] sm:$0xff] %v2632_v11  ;;  %3740 = vst [vmem:[#allocation6_spill] sm:$0xff] %v2636_v12  ;;  %v2642_v14 = vld [vmem:[#allocation2 + $0xd8] sm:$0xff]  ;;  %v2647_v15 = vld [vmem:[#allocation2 + $0xa8] sm:$0xff] }
  0x23   :  { %3741 = vst [vmem:[#allocation7_spill] sm:$0xff] %v2638_v13  ;;  %3742 = vst [vmem:[#allocation8_spill] sm:$0xff] %v2642_v14  ;;  %v2651_v18 = vld [vmem:[#allocation2 + $0xd0] sm:$0xff]  ;;  %v2655_v19 = vld [vmem:[#allocation2 + $0xa0] sm:$0xff] }
  0x24   :  { %135 = vperm.xlu1 %2154, %v54_v22   ;;  %130 = vperm.xlu0 %2153, %v53_v23   ;;  %3743 = vst [vmem:[#allocation9_spill] sm:$0xff] %v2647_v15  ;;  %3744 = vst [vmem:[#allocation10_spill] sm:$0xff] %v2651_v18  ;;  %v2660_v22 = vld [vmem:[#allocation2 + $0xb8] sm:$0xff]  ;;  %v2662_v23 = vld [vmem:[#allocation2 + $0x88] sm:$0xff] }
  0x25   :  { %3745 = vst [vmem:[#allocation11_spill] sm:$0xff] %v2655_v19  ;;  %3746 = vst [vmem:[#allocation12_spill] sm:$0xff] %v2660_v22  ;;  %v2728_v28 = vld [vmem:[#allocation2] sm:$0xff] }
  0x26   :  { %3747 = vst [vmem:[#allocation13_spill] sm:$0xff] %v2662_v23  ;;  %3765 = vst [vmem:[#allocation31_spill] sm:$0xff] %v2728_v28 }
  0x28   :  { %145 = vperm.xlu1 %2154, %v56_v24   ;;  %140 = vperm.xlu0 %2153, %v55_v25   ;;  %v2666_v24 = vld [vmem:[#allocation2 + $0xb0] sm:$0xff]  ;;  %v2668_v25 = vld [vmem:[#allocation2 + $0x80] sm:$0xff] }
  0x29   :  { %3748 = vst [vmem:[#allocation14_spill] sm:$0xff] %v2666_v24  ;;  %3749 = vst [vmem:[#allocation15_spill] sm:$0xff] %v2668_v25 }
  0x2c   :  { %155 = vperm.xlu1 %2154, %v58_v26   ;;  %150 = vperm.xlu0 %2153, %v57_v27   ;;  %v2672_v26 = vld [vmem:[#allocation2 + $0x98] sm:$0xff]  ;;  %v2677_v27 = vld [vmem:[#allocation2 + $0x68] sm:$0xff] }
  0x2d   :  { %3750 = vst [vmem:[#allocation16_spill] sm:$0xff] %v2672_v26  ;;  %3751 = vst [vmem:[#allocation17_spill] sm:$0xff] %v2677_v27 }
  0x8b   :  { %v63_v30 = vpop.permute.xlu0 %62  ;;  %v69_v42 = vpop.permute.xlu1 %68 }
  0x8c   :  { %vm85_vm1 = vcmp.eq.s32.totalorder %v63_v30, %v2508_v29  ;;  %vm87_vm3 = vcmp.eq.s32.totalorder %v69_v42, %v2508_v29  ;;  %v2681_v30 = vld [vmem:[#allocation2 + $0x90] sm:$0xff]  ;;  %v2690_v42 = vld [vmem:[#allocation2 + $0x78] sm:$0xff] }
  0x8d   :  { %v2045_v33 = vsel %vm85_vm1, 1.0, %v3636_v1  ;;  %v2047_v49 = vsel %vm87_vm3, 1.0, %v3636_v1  ;;  %3752 = vst [vmem:[#allocation18_spill] sm:$0xff] %v2681_v30  ;;  %3754 = vst [vmem:[#allocation20_spill] sm:$0xff] %v2690_v42 }
  0x8e   :  { %2053 = vmatmul.mubr.msk.f32.vlgmr.msra.gmra.mxu0 %vm211_vm0, %v2045_v33  ;;  %2061 = vmatmul.mubr.msk.f32.vlgmr.msra.gmra.mxu1 %vm211_vm0, %v2045_v33  ;;  %v2685_v33 = vld [vmem:[#allocation2 + $0x60] sm:$0xff] }
  0x8f   :  { %581 = vmatpush1.msra.mxu0 %v2511_v31  ;;  %652 = vmatpush1.msra.mxu1 %v2513_v32  ;;  %v66_v37 = vpop.permute.xlu0 %65  ;;  %v72_v56 = vpop.permute.xlu1 %71  ;;  %3753 = vst [vmem:[#allocation19_spill] sm:$0xff] %v2685_v33 }
  0x90   :  { %582 = vmatprep.subr.mxu0 %v2516_v34  ;;  %vm86_vm2 = vcmp.eq.s32.totalorder %v66_v37, %v2508_v29  ;;  %653 = vmatprep.subr.mxu1 %v2518_v35  ;;  %vm88_vm4 = vcmp.eq.s32.totalorder %v72_v56, %v2508_v29  ;;  %v2696_v56 = vld [vmem:[#allocation2 + $0x70] sm:$0xff] }
  0x91   :  { %v2046_v40 = vsel %vm86_vm2, 1.0, %v3636_v1  ;;  %583 = vmatpush1.msra.mxu0 %v2522_v36  ;;  %306 = vmatprep.mubr.f32.mxu0 %v3636_v1  ;;  %v2048_v61 = vsel %vm88_vm4, 1.0, %v3636_v1  ;;  %3756 = vst [vmem:[#allocation22_spill] sm:$0xff] %v2696_v56 }
  0x92   :  { %419 = vmatprep.mubr.f32.mxu1 %v3636_v1  ;;  %584 = vmatprep.subr.mxu0 %v2526_v38 }
  0x93   :  { %654 = vmatpush1.msra.mxu1 %v2531_v39  ;;  %2054 = vmatmul.mubr.msk.f32.gmra.mxu0 %vm211_vm0, %v2046_v40  ;;  %v75_v62 = vpop.permute.xlu0 %74  ;;  %v78_v8 = vpop.permute.xlu1 %77 }
  0x94   :  { %2062 = vmatmul.mubr.msk.f32.gmra.mxu1 %vm211_vm0, %v2046_v40  ;;  %585 = vmatpush1.msra.mxu0 %v2536_v41  ;;  %vm89_vm5 = vcmp.eq.s32.totalorder %v75_v62, %v2508_v29  ;;  %vm90_vm6 = vcmp.eq.s32.totalorder %v78_v8, %v2508_v29  ;;  %v2702_v62 = vld [vmem:[#allocation2 + $0x58] sm:$0xff]  ;;  %v2707_v8 = vld [vmem:[#allocation2 + $0x28] sm:$0xff] }
  0x95   :  { %655 = vmatprep.subr.mxu1 %v2540_v43  ;;  %586 = vmatprep.subr.mxu0 %v2542_v44  ;;  %v2049_v9 = vsel %vm89_vm5, 1.0, %v3636_v1  ;;  %v2050_v20 = vsel %vm90_vm6, 1.0, %v3636_v1  ;;  %3758 = vst [vmem:[#allocation24_spill] sm:$0xff] %v2702_v62  ;;  %3759 = vst [vmem:[#allocation25_spill] sm:$0xff] %v2707_v8 }
  0x96   :  { %656 = vmatpush1.msra.mxu1 %v2547_v45  ;;  %587 = vmatpush1.msra.mxu0 %v2549_v46 }
  0x97   :  { %657 = vmatprep.subr.mxu1 %v2553_v47  ;;  %312 = vmatprep.mubr.f32.mxu0 %v3636_v1  ;;  %v81_v21 = vpop.permute.xlu0 %80  ;;  %v84_v37 = vpop.permute.xlu1 %83 }
  0x98   :  { %425 = vmatprep.mubr.f32.mxu1 %v3636_v1  ;;  %588 = vmatprep.subr.mxu0 %v2557_v48  ;;  %vm91_vm7 = vcmp.eq.s32.totalorder %v81_v21, %v2508_v29  ;;  %vm92_vm8 = vcmp.eq.s32.totalorder %v84_v37, %v2508_v29  ;;  %v2720_v21 = vld [vmem:[#allocation2 + $0x38] sm:$0xff]  ;;  %v2722_v37 = vld [vmem:[#allocation2 + $0x8] sm:$0xff] }
  0x99   :  { %658 = vmatpush1.msra.mxu1 %v2562_v50  ;;  %2055 = vmatmul.mubr.msk.f32.gmra.mxu0 %vm211_vm0, %v2047_v49  ;;  %v2051_v40 = vsel %vm91_vm7, 1.0, %v3636_v1  ;;  %v2052_v29 = vsel %vm92_vm8, 1.0, %v3636_v1  ;;  %3762 = vst [vmem:[#allocation28_spill] sm:$0xff] %v2720_v21  ;;  %3763 = vst [vmem:[#allocation29_spill] sm:$0xff] %v2722_v37 }
  0x9a   :  { %2063 = vmatmul.mubr.msk.f32.gmra.mxu1 %vm211_vm0, %v2047_v49  ;;  %589 = vmatpush1.msra.mxu0 %v2566_v51  ;;  %v2692_v49 = vld [vmem:[#allocation2 + $0x48] sm:$0xff] }
  0x9b   :  { %659 = vmatprep.subr.mxu1 %v2570_v52  ;;  %590 = vmatprep.subr.mxu0 %v2572_v53  ;;  %3755 = vst [vmem:[#allocation21_spill] sm:$0xff] %v2692_v49 }
  0x9c   :  { %660 = vmatpush1.msra.mxu1 %v2576_v54  ;;  %591 = vmatpush1.msra.mxu0 %v2578_v55 }
  0x9d   :  { %661 = vmatprep.subr.mxu1 %v2582_v57  ;;  %318 = vmatprep.mubr.f32.mxu0 %v3636_v1 }
  0x9e   :  { %431 = vmatprep.mubr.f32.mxu1 %v3636_v1  ;;  %592 = vmatprep.subr.mxu0 %v2587_v58 }
  0x9f   :  { %662 = vmatpush1.msra.mxu1 %v2591_v59  ;;  %2056 = vmatmul.mubr.msk.f32.gmra.mxu0 %vm211_vm0, %v2048_v61 }
  0xa0   :  { %2064 = vmatmul.mubr.msk.f32.gmra.mxu1 %vm211_vm0, %v2048_v61  ;;  %593 = vmatpush1.msra.mxu0 %v2595_v60  ;;  %v2698_v61 = vld [vmem:[#allocation2 + $0x40] sm:$0xff] }
  0xa1   :  { %663 = vmatprep.subr.mxu1 %v2600_v63  ;;  %594 = vmatprep.subr.mxu0 %v2602_v0  ;;  %3757 = vst [vmem:[#allocation23_spill] sm:$0xff] %v2698_v61 }
  0xa2   :  { %664 = vmatpush1.msra.mxu1 %v2606_v2  ;;  %595 = vmatpush1.msra.mxu0 %v2608_v3 }
  0xa3   :  { %665 = vmatprep.subr.mxu1 %v2612_v4  ;;  %324 = vmatprep.mubr.f32.mxu0 %v3636_v1 }
  0xa4   :  { %437 = vmatprep.mubr.f32.mxu1 %v3636_v1  ;;  %596 = vmatprep.subr.mxu0 %v2617_v5 }
  0xa5   :  { %666 = vmatpush1.msra.mxu1 %v2621_v6  ;;  %2057 = vmatmul.mubr.msk.f32.gmra.mxu0 %vm211_vm0, %v2049_v9 }
  0xa6   :  { %2065 = vmatmul.mubr.msk.f32.gmra.mxu1 %vm211_vm0, %v2049_v9  ;;  %597 = vmatpush1.msra.mxu0 %v2625_v7  ;;  %v2711_v9 = vld [vmem:[#allocation2 + $0x50] sm:$0xff] }
  0xa7   :  { %667 = vmatprep.subr.mxu1 %v2630_v10  ;;  %598 = vmatprep.subr.mxu0 %v2632_v11  ;;  %3760 = vst [vmem:[#allocation26_spill] sm:$0xff] %v2711_v9 }
  0xa8   :  { %668 = vmatpush1.msra.mxu1 %v2636_v12  ;;  %599 = vmatpush1.msra.mxu0 %v2638_v13 }
  0xa9   :  { %669 = vmatprep.subr.mxu1 %v2642_v14  ;;  %330 = vmatprep.mubr.f32.mxu0 %v3636_v1 }
  0xaa   :  { %443 = vmatprep.mubr.f32.mxu1 %v3636_v1  ;;  %600 = vmatprep.subr.mxu0 %v2647_v15 }
  0xab   :  { %670 = vmatpush1.msra.mxu1 %v2651_v18  ;;  %2058 = vmatmul.mubr.msk.f32.gmra.mxu0 %vm211_vm0, %v2050_v20 }
  0xac   :  { %2066 = vmatmul.mubr.msk.f32.gmra.mxu1 %vm211_vm0, %v2050_v20  ;;  %601 = vmatpush1.msra.mxu0 %v2655_v19  ;;  %v2715_v20 = vld [vmem:[#allocation2 + $0x20] sm:$0xff] }
  0xad   :  { %671 = vmatprep.subr.mxu1 %v2660_v22  ;;  %602 = vmatprep.subr.mxu0 %v2662_v23  ;;  %3761 = vst [vmem:[#allocation27_spill] sm:$0xff] %v2715_v20 }
  0xae   :  { %672 = vmatpush1.msra.mxu1 %v2666_v24  ;;  %603 = vmatpush1.msra.mxu0 %v2668_v25 }
  0xaf   :  { %673 = vmatprep.subr.mxu1 %v2672_v26  ;;  %336 = vmatprep.mubr.f32.mxu0 %v3636_v1 }
  0xb0   :  { %449 = vmatprep.mubr.f32.mxu1 %v3636_v1  ;;  %604 = vmatprep.subr.mxu0 %v2677_v27 }
  0xb1   :  { %674 = vmatpush1.msra.mxu1 %v2681_v30  ;;  %2059 = vmatmul.mubr.msk.f32.gmra.mxu0 %vm211_vm0, %v2051_v40 }
  0xb2   :  { %2067 = vmatmul.mubr.msk.f32.gmra.mxu1 %vm211_vm0, %v2051_v40  ;;  %605 = vmatpush1.msra.mxu0 %v2685_v33  ;;  %v2726_v40 = vld [vmem:[#allocation2 + $0x30] sm:$0xff] }
  0xb3   :  { %675 = vmatprep.subr.mxu1 %v2690_v42  ;;  %606 = vmatprep.subr.mxu0 %v2692_v49  ;;  %3764 = vst [vmem:[#allocation30_spill] sm:$0xff] %v2726_v40 }
  0xb4   :  { %676 = vmatpush1.msra.mxu1 %v2696_v56  ;;  %607 = vmatpush1.msra.mxu0 %v2698_v61  ;;  %v2732_v61 = vld [vmem:[#allocation2 + $0x18] sm:$0xff] }
  0xb5   :  { %677 = vmatprep.subr.mxu1 %v2702_v62  ;;  %342 = vmatprep.mubr.f32.mxu0 %v3636_v1  ;;  %3766 = vst [vmem:[#allocation32_spill] sm:$0xff] %v2732_v61 }
  0xb6   :  { %455 = vmatprep.mubr.f32.mxu1 %v3636_v1  ;;  %608 = vmatprep.subr.mxu0 %v2707_v8  ;;  %v2736_v1 = vld [vmem:[#allocation2 + $0x10] sm:$0xff]  ;;  %v3768_v8 = vmov 0.0  }
  0xb7   :  { %678 = vmatpush1.msra.mxu1 %v2711_v9  ;;  %2060 = vmatmul.mubr.msk.f32.gmra.mxu0 %vm211_vm0, %v2052_v29  ;;  %3767 = vst [vmem:[#allocation33_spill] sm:$0xff] %v2736_v1 }
  0xb8   :  { %2068 = vmatmul.mubr.msk.f32.gmra.mxu1 %vm211_vm0, %v2052_v29  ;;  %609 = vmatpush1.msra.mxu0 %v2715_v20  ;;  %v3769_v29 = vld [vmem:[#allocation23_spill] sm:$0xff] }
  0xb9   :  { %679 = vmatprep.subr.mxu1 %v2720_v21  ;;  %610 = vmatprep.subr.mxu0 %v2722_v37 }
  0xba   :  { %680 = vmatpush1.msra.mxu1 %v2726_v40  ;;  %611 = vmatpush1.msra.mxu0 %v2728_v28 }
  0xbb   :  { %681 = vmatprep.subr.mxu1 %v2732_v61  ;;  %644 = vmatprep.mubr.f32.mxu0 %v3768_v8 }
  0xbc   :  { %682 = vmatpush1.msra.mxu1 %v2736_v1  ;;  %715 = vmatprep.mubr.f32.mxu1 %v3768_v8 }
  0xbd   :  { %645 = vmatmul.mubr.f32.vlgmr.msra.gmra.mxu0 %v3768_v8  ;;  %716 = vmatmul.mubr.f32.vlgmr.msra.gmra.mxu1 %v3768_v8 }
  0xbe   :  { %750 = vmatprep.subr.mxu0 %v2471_v16  ;;  %821 = vmatprep.subr.mxu1 %v2473_v17 }
  0xbf   :  { %751 = vmatpush1.msra.mxu0 %v2511_v31  ;;  %822 = vmatpush1.msra.mxu1 %v2513_v32 }
  0xc0   :  { %752 = vmatprep.subr.mxu0 %v2516_v34  ;;  %823 = vmatprep.subr.mxu1 %v2518_v35 }
  0xc1   :  { %753 = vmatpush1.msra.mxu0 %v2522_v36  ;;  %824 = vmatpush1.msra.mxu1 %v2531_v39 }
  0xc2   :  { %754 = vmatprep.subr.mxu0 %v2526_v38  ;;  %825 = vmatprep.subr.mxu1 %v2540_v43 }
  0xc3   :  { %755 = vmatpush1.msra.mxu0 %v2536_v41  ;;  %826 = vmatpush1.msra.mxu1 %v2547_v45 }
  0xc4   :  { %756 = vmatprep.subr.mxu0 %v2542_v44  ;;  %827 = vmatprep.subr.mxu1 %v2553_v47 }
  0xc5   :  { %757 = vmatpush1.msra.mxu0 %v2549_v46  ;;  %828 = vmatpush1.msra.mxu1 %v2562_v50 }
  0xc6   :  { %758 = vmatprep.subr.mxu0 %v2557_v48  ;;  %829 = vmatprep.subr.mxu1 %v2570_v52 }
  0xc7   :  { %759 = vmatpush1.msra.mxu0 %v2566_v51  ;;  %830 = vmatpush1.msra.mxu1 %v2576_v54 }
  0xc8   :  { %760 = vmatprep.subr.mxu0 %v2572_v53  ;;  %831 = vmatprep.subr.mxu1 %v2582_v57 }
  0xc9   :  { %761 = vmatpush1.msra.mxu0 %v2578_v55  ;;  %832 = vmatpush1.msra.mxu1 %v2591_v59 }
  0xca   :  { %762 = vmatprep.subr.mxu0 %v2587_v58  ;;  %833 = vmatprep.subr.mxu1 %v2600_v63 }
  0xcb   :  { %763 = vmatpush1.msra.mxu0 %v2595_v60  ;;  %834 = vmatpush1.msra.mxu1 %v2606_v2 }
  0xcc   :  { %764 = vmatprep.subr.mxu0 %v2602_v0  ;;  %835 = vmatprep.subr.mxu1 %v2612_v4 }
  0xcd   :  { %765 = vmatpush1.msra.mxu0 %v2608_v3  ;;  %836 = vmatpush1.msra.mxu1 %v2621_v6 }
  0xce   :  { %766 = vmatprep.subr.mxu0 %v2617_v5  ;;  %837 = vmatprep.subr.mxu1 %v2630_v10 }
  0xcf   :  { %767 = vmatpush1.msra.mxu0 %v2625_v7  ;;  %838 = vmatpush1.msra.mxu1 %v2636_v12 }
  0xd0   :  { %768 = vmatprep.subr.mxu0 %v2632_v11  ;;  %839 = vmatprep.subr.mxu1 %v2642_v14 }
  0xd1   :  { %769 = vmatpush1.msra.mxu0 %v2638_v13  ;;  %840 = vmatpush1.msra.mxu1 %v2651_v18 }
  0xd2   :  { %770 = vmatprep.subr.mxu0 %v2647_v15  ;;  %841 = vmatprep.subr.mxu1 %v2660_v22 }
  0xd3   :  { %771 = vmatpush1.msra.mxu0 %v2655_v19  ;;  %842 = vmatpush1.msra.mxu1 %v2666_v24 }
  0xd4   :  { %772 = vmatprep.subr.mxu0 %v2662_v23  ;;  %843 = vmatprep.subr.mxu1 %v2672_v26  ;;  %v3770_v26 = vld [vmem:[#allocation25_spill] sm:$0xff] }
  0xd5   :  { %773 = vmatpush1.msra.mxu0 %v2668_v25  ;;  %844 = vmatpush1.msra.mxu1 %v2681_v30 }
  0xd6   :  { %774 = vmatprep.subr.mxu0 %v2677_v27  ;;  %845 = vmatprep.subr.mxu1 %v2690_v42 }
  0xd7   :  { %775 = vmatpush1.msra.mxu0 %v2685_v33  ;;  %846 = vmatpush1.msra.mxu1 %v2696_v56 }
  0xd8   :  { %776 = vmatprep.subr.mxu0 %v2692_v49  ;;  %847 = vmatprep.subr.mxu1 %v2702_v62 }
  0xd9   :  { %777 = vmatpush1.msra.mxu0 %v3769_v29  ;;  %848 = vmatpush1.msra.mxu1 %v2711_v9 }
  0xda   :  { %778 = vmatprep.subr.mxu0 %v3770_v26  ;;  %849 = vmatprep.subr.mxu1 %v2720_v21  ;;  %v3771_v21 = vlaneseq }
  0xdb   :  { %779 = vmatpush1.msra.mxu0 %v2715_v20  ;;  %850 = vmatpush1.msra.mxu1 %v2726_v40 }
  0xdc   :  { %780 = vmatprep.subr.mxu0 %v2722_v37  ;;  %851 = vmatprep.subr.mxu1 %v2732_v61  ;;  %v160_v20 = vshrl.u32 %v3771_v21, 7  ;;  %v117_v37 = vld [vmem:[%s3627_s3] sm:$0xf] }
  0xdd   :  { %781 = vmatpush1.msra.mxu0 %v2728_v28  ;;  %814 = vmatprep.mubr.f32.mxu0 %v3768_v8 }
  0xde   :  { %852 = vmatpush1.msra.mxu1 %v2736_v1  ;;  %885 = vmatprep.mubr.f32.mxu1 %v3768_v8  ;;  %v161_v26 = vsub.s32 0, %v160_v20  ;;  %v169_v61 = vsub.s32 2, %v160_v20  ;;  %v165_v40 = vsub.s32 1, %v160_v20  ;;  %v173_v28 = vsub.s32 3, %v160_v20  ;;  %v126_v8 = vpop.permute.xlu1 %125  ;;  %v462_v20 = vld [vmem:[%s3628_s4] sm:$0xf] }
  0xdf   :  { %920 = vmatprep.subr.mxu0 %v2471_v16  ;;  %991 = vmatprep.subr.mxu1 %v2473_v17  ;;  %v2824_v16 = vpop.permute.xlu0 %120 }
  0xe0   :  { %v2818_v9 = vrot.slane %v117_v37, %v161_v26  ;;  %v2826_v17 = vrot.slane %v117_v37, %v169_v61  ;;  %v2828_v21 = vrot.slane %v117_v37, %v165_v40  ;;  %v2834_v56 = vrot.slane %v117_v37, %v173_v28 }
  0xe1   :  { %v2842_v24 = vrot.slane %v462_v20, %v161_v26  ;;  %v2845_v18 = vrot.slane %v462_v20, %v169_v61  ;;  %v2847_v11 = vrot.slane %v462_v20, %v165_v40 }
  0xe2   :  { %v183_v33 = vmul.f32 %v2818_v9, %v126_v8  ;;  %v185_v27 = vmul.f32 %v2826_v17, %v126_v8  ;;  %v184_v23 = vmul.f32 %v2828_v21, %v126_v8  ;;  %v186_v37 = vmul.f32 %v2834_v56, %v126_v8 }
  0xe3   :  { %v131_v19 = vpop.permute.xlu0 %130 }
 0x14e   :  { %v2820_v29 = vpop.f32.mrf.mxu0  ;;  %v2822_v1 = vpop.f32.mrf.mxu1 }
 0x150   :  { %v2830_v62 = vpop.f32.mrf.mxu0  ;;  %v2832_v49 = vpop.f32.mrf.mxu1 }
 0x153   :  { %v308_v42 = vpop.f32.mrf.mxu0 }
 0x154   :  { %v309_v30 = vadd.f32 %v308_v42, %v183_v33  ;;  %v421_v25 = vpop.f32.mrf.mxu1  ;;  %v2852_v42 = vrot.slane %v462_v20, %v173_v28  ;;  %v136_v28 = vpop.permute.xlu1 %135 }
 0x155   :  { %v422_v22 = vadd.f32 %v421_v25, %v185_v27  ;;  %v310_v15 = vpop.f32.mrf.mxu0  ;;  %v187_v25 = vmul.f32 %v2818_v9, %v131_v19 }
 0x156   :  { %v311_v13 = vadd.f32 %v310_v15, %v184_v23  ;;  %v423_v14 = vpop.f32.mrf.mxu1  ;;  %v2850_v12 = vadd.f32 %v2842_v24, %v309_v30  ;;  %v189_v15 = vmul.f32 %v2826_v17, %v131_v19 }
 0x157   :  { %v424_v33 = vadd.f32 %v423_v14, %v186_v37  ;;  %v2855_v26 = vadd.f32 %v2845_v18, %v422_v22  ;;  %v188_v14 = vmul.f32 %v2828_v21, %v131_v19  ;;  %v190_v22 = vmul.f32 %v2834_v56, %v131_v19 }
 0x158   :  { %3772 = vst [vmem:[#allocation34_spill] sm:$0xff] %v2850_v12  ;;  %v2859_v27 = vadd.f32 %v2847_v11, %v311_v13 }
 0x159   :  { %3773 = vst [vmem:[#allocation35_spill] sm:$0xff] %v2855_v26  ;;  %v314_v61 = vpop.f32.mrf.mxu0  ;;  %v2863_v23 = vadd.f32 %v2852_v42, %v424_v33  ;;  %v191_v33 = vmul.f32 %v2818_v9, %v136_v28 }
 0x15a   :  { %3774 = vst [vmem:[#allocation36_spill] sm:$0xff] %v2859_v27  ;;  %v315_v8 = vadd.f32 %v314_v61, %v187_v25  ;;  %v427_v30 = vpop.f32.mrf.mxu1 }
 0x15b   :  { %3775 = vst [vmem:[#allocation37_spill] sm:$0xff] %v2863_v23  ;;  %v428_v40 = vadd.f32 %v427_v30, %v189_v15  ;;  %v316_v20 = vpop.f32.mrf.mxu0  ;;  %v193_v15 = vmul.f32 %v2826_v17, %v136_v28 }
 0x15c   :  { %v317_v37 = vadd.f32 %v316_v20, %v188_v14  ;;  %v429_v26 = vpop.f32.mrf.mxu1  ;;  %v2868_v13 = vadd.f32 %v2842_v24, %v315_v8  ;;  %v192_v8 = vmul.f32 %v2828_v21, %v136_v28  ;;  %v141_v20 = vpop.permute.xlu0 %140 }
 0x15d   :  { %v430_v27 = vadd.f32 %v429_v26, %v190_v22  ;;  %v2871_v12 = vadd.f32 %v2845_v18, %v428_v40  ;;  %v194_v40 = vmul.f32 %v2834_v56, %v136_v28 }
 0x15e   :  { %3776 = vst [vmem:[#allocation38_spill] sm:$0xff] %v2868_v13  ;;  %v2875_v25 = vadd.f32 %v2847_v11, %v317_v37 }
 0x15f   :  { %3777 = vst [vmem:[#allocation39_spill] sm:$0xff] %v2871_v12  ;;  %v320_v61 = vpop.f32.mrf.mxu0  ;;  %v2879_v30 = vadd.f32 %v2852_v42, %v430_v27  ;;  %v195_v27 = vmul.f32 %v2818_v9, %v141_v20 }
 0x160   :  { %3778 = vst [vmem:[#allocation40_spill] sm:$0xff] %v2875_v25  ;;  %v321_v19 = vadd.f32 %v320_v61, %v191_v33  ;;  %v433_v14 = vpop.f32.mrf.mxu1 }
 0x161   :  { %3779 = vst [vmem:[#allocation41_spill] sm:$0xff] %v2879_v30  ;;  %v434_v26 = vadd.f32 %v433_v14, %v193_v15  ;;  %v322_v22 = vpop.f32.mrf.mxu0  ;;  %v197_v15 = vmul.f32 %v2826_v17, %v141_v20 }
 0x162   :  { %v323_v12 = vadd.f32 %v322_v22, %v192_v8  ;;  %v435_v13 = vpop.f32.mrf.mxu1  ;;  %v2884_v37 = vadd.f32 %v2842_v24, %v321_v19  ;;  %v196_v19 = vmul.f32 %v2828_v21, %v141_v20  ;;  %v146_v22 = vpop.permute.xlu1 %145 }
 0x163   :  { %v436_v25 = vadd.f32 %v435_v13, %v194_v40  ;;  %v2887_v23 = vadd.f32 %v2845_v18, %v434_v26  ;;  %v198_v26 = vmul.f32 %v2834_v56, %v141_v20 }
 0x164   :  { %3780 = vst [vmem:[#allocation42_spill] sm:$0xff] %v2884_v37  ;;  %v2891_v33 = vadd.f32 %v2847_v11, %v323_v12 }
 0x165   :  { %3781 = vst [vmem:[#allocation43_spill] sm:$0xff] %v2887_v23  ;;  %v326_v61 = vpop.f32.mrf.mxu0  ;;  %v2895_v14 = vadd.f32 %v2852_v42, %v436_v25  ;;  %v199_v25 = vmul.f32 %v2818_v9, %v146_v22 }
 0x166   :  { %3782 = vst [vmem:[#allocation44_spill] sm:$0xff] %v2891_v33  ;;  %v327_v28 = vadd.f32 %v326_v61, %v195_v27  ;;  %v439_v8 = vpop.f32.mrf.mxu1 }
 0x167   :  { %3783 = vst [vmem:[#allocation45_spill] sm:$0xff] %v2895_v14  ;;  %v440_v13 = vadd.f32 %v439_v8, %v197_v15  ;;  %v328_v40 = vpop.f32.mrf.mxu0  ;;  %v201_v15 = vmul.f32 %v2826_v17, %v146_v22 }
 0x168   :  { %v329_v23 = vadd.f32 %v328_v40, %v196_v19  ;;  %v441_v37 = vpop.f32.mrf.mxu1  ;;  %v2900_v12 = vadd.f32 %v2842_v24, %v327_v28  ;;  %v200_v28 = vmul.f32 %v2828_v21, %v146_v22  ;;  %v151_v40 = vpop.permute.xlu0 %150 }
 0x169   :  { %v442_v33 = vadd.f32 %v441_v37, %v198_v26  ;;  %v2903_v30 = vadd.f32 %v2845_v18, %v440_v13  ;;  %v202_v13 = vmul.f32 %v2834_v56, %v146_v22 }
 0x16a   :  { %3784 = vst [vmem:[#allocation46_spill] sm:$0xff] %v2900_v12  ;;  %v2907_v27 = vadd.f32 %v2847_v11, %v329_v23 }
 0x16b   :  { %3785 = vst [vmem:[#allocation47_spill] sm:$0xff] %v2903_v30  ;;  %v332_v61 = vpop.f32.mrf.mxu0  ;;  %v2911_v8 = vadd.f32 %v2852_v42, %v442_v33  ;;  %v203_v33 = vmul.f32 %v2818_v9, %v151_v40 }
 0x16c   :  { %3786 = vst [vmem:[#allocation48_spill] sm:$0xff] %v2907_v27  ;;  %v333_v20 = vadd.f32 %v332_v61, %v199_v25  ;;  %v445_v19 = vpop.f32.mrf.mxu1 }
 0x16d   :  { %3787 = vst [vmem:[#allocation49_spill] sm:$0xff] %v2911_v8  ;;  %v446_v37 = vadd.f32 %v445_v19, %v201_v15  ;;  %v334_v26 = vpop.f32.mrf.mxu0  ;;  %v205_v15 = vmul.f32 %v2826_v17, %v151_v40 }
 0x16e   :  { %v335_v30 = vadd.f32 %v334_v26, %v200_v28  ;;  %v447_v12 = vpop.f32.mrf.mxu1  ;;  %v2916_v23 = vadd.f32 %v2842_v24, %v333_v20  ;;  %v204_v20 = vmul.f32 %v2828_v21, %v151_v40  ;;  %v156_v26 = vpop.permute.xlu1 %155 }
 0x16f   :  { %v448_v27 = vadd.f32 %v447_v12, %v202_v13  ;;  %v2919_v14 = vadd.f32 %v2845_v18, %v446_v37  ;;  %v206_v37 = vmul.f32 %v2834_v56, %v151_v40  ;;  %v209_v40 = vmul.f32 %v2826_v17, %v156_v26 }
 0x170   :  { %3788 = vst [vmem:[#allocation50_spill] sm:$0xff] %v2916_v23  ;;  %v2923_v25 = vadd.f32 %v2847_v11, %v335_v30 }
 0x171   :  { %3789 = vst [vmem:[#allocation51_spill] sm:$0xff] %v2919_v14  ;;  %v338_v61 = vpop.f32.mrf.mxu0  ;;  %v2927_v19 = vadd.f32 %v2852_v42, %v448_v27  ;;  %v179_v27 = vmul.f32 %v2818_v9, %v2824_v16 }
 0x172   :  { %3790 = vst [vmem:[#allocation52_spill] sm:$0xff] %v2923_v25  ;;  %v339_v22 = vadd.f32 %v338_v61, %v203_v33  ;;  %v451_v28 = vpop.f32.mrf.mxu1  ;;  %v207_v33 = vmul.f32 %v2818_v9, %v156_v26 }
 0x173   :  { %3791 = vst [vmem:[#allocation53_spill] sm:$0xff] %v2927_v19  ;;  %v452_v12 = vadd.f32 %v451_v28, %v205_v15  ;;  %v340_v13 = vpop.f32.mrf.mxu0 }
 0x174   :  { %v341_v14 = vadd.f32 %v340_v13, %v204_v20  ;;  %v453_v23 = vpop.f32.mrf.mxu1  ;;  %v2932_v30 = vadd.f32 %v2842_v24, %v339_v22  ;;  %v303_v22 = vadd.f32 %v2820_v29, %v179_v27  ;;  %v208_v13 = vmul.f32 %v2828_v21, %v156_v26 }
 0x175   :  { %v454_v25 = vadd.f32 %v453_v23, %v206_v37  ;;  %v2935_v8 = vadd.f32 %v2845_v18, %v452_v12  ;;  %v180_v23 = vmul.f32 %v2828_v21, %v2824_v16 }
 0x176   :  { %3792 = vst [vmem:[#allocation54_spill] sm:$0xff] %v2932_v30  ;;  %v2941_v61 = vadd.f32 %v2847_v11, %v341_v14  ;;  %v210_v14 = vmul.f32 %v2834_v56, %v156_v26  ;;  %v484_v27 = vadd.f32 %v2842_v24, %v303_v22 }
 0x177   :  { %3793 = vst [vmem:[#allocation55_spill] sm:$0xff] %v2935_v8  ;;  %v344_v15 = vpop.f32.mrf.mxu0  ;;  %v2945_v28 = vadd.f32 %v2852_v42, %v454_v25  ;;  %v305_v8 = vadd.f32 %v2830_v62, %v180_v23 }
 0x178   :  { %3794 = vst [vmem:[#allocation56_spill] sm:$0xff] %v2941_v61  ;;  %v345_v20 = vadd.f32 %v344_v15, %v207_v33  ;;  %v457_v12 = vpop.f32.mrf.mxu1 }
 0x179   :  { %3795 = vst [vmem:[#allocation57_spill] sm:$0xff] %v2945_v28  ;;  %v458_v37 = vadd.f32 %v457_v12, %v209_v40  ;;  %v346_v9 = vpop.f32.mrf.mxu0  ;;  %v485_v62 = vadd.f32 %v2847_v11, %v305_v8 }
 0x17a   :  { %v347_v61 = vadd.f32 %v346_v9, %v208_v13  ;;  %v459_v30 = vpop.f32.mrf.mxu1  ;;  %v2954_v25 = vadd.f32 %v2842_v24, %v345_v20 }
 0x17b   :  { %v460_v28 = vadd.f32 %v459_v30, %v210_v14  ;;  %v2957_v29 = vadd.f32 %v2845_v18, %v458_v37  ;;  %v182_v30 = vmul.f32 %v2834_v56, %v2824_v16 }
 0x17c   :  { %3796 = vst [vmem:[#allocation58_spill] sm:$0xff] %v2954_v25  ;;  %v2961_v33 = vadd.f32 %v2847_v11, %v347_v61  ;;  %v3834_v25 = vld [vmem:[#allocation37_spill] sm:$0xff] }
 0x17d   :  { %3797 = vst [vmem:[#allocation59_spill] sm:$0xff] %v2957_v29  ;;  %v646_v21 = vpop.f32.mrf.mxu0  ;;  %v2964_v15 = vadd.f32 %v2852_v42, %v460_v28  ;;  %v717_v12 = vpop.f32.mrf.mxu1  ;;  %v418_v24 = vadd.f32 %v2832_v49, %v182_v30  ;;  %v181_v28 = vmul.f32 %v2826_v17, %v2824_v16 }
 0x17e   :  { %3798 = vst [vmem:[#allocation60_spill] sm:$0xff] %v2961_v33  ;;  %v722_v26 = vadd.f32 %v646_v21, %v484_v27 }
 0x17f   :  { %3799 = vst [vmem:[#allocation61_spill] sm:$0xff] %v2964_v15  ;;  %v648_v40 = vpop.f32.mrf.mxu0  ;;  %v719_v61 = vpop.f32.mrf.mxu1  ;;  %v487_v22 = vadd.f32 %v2852_v42, %v418_v24  ;;  %v416_v11 = vadd.f32 %v2822_v1, %v181_v28  ;;  %v3816_v24 = vld [vmem:[#allocation22_spill] sm:$0xff]  ;;  %v3818_v28 = vld [vmem:[#allocation24_spill] sm:$0xff] }
 0x180   :  { %v2069_v23 = vmul.f32 -1.442695, %v722_v26  ;;  %v723_v20 = vadd.f32 %v648_v40, %v485_v62 }
 0x181   :  { %v725_v8 = vadd.f32 %v719_v61, %v487_v22  ;;  %v486_v37 = vadd.f32 %v2845_v18, %v416_v11  ;;  %v3817_v61 = vld [vmem:[#allocation21_spill] sm:$0xff]  ;;  %v3819_v22 = vld [vmem:[#allocation23_spill] sm:$0xff]  ;;  %v3820_v11 = vld [vmem:[#allocation26_spill] sm:$0xff] }
 0x182   :  { %2155 = vpow2.f32 %v2069_v23  ;;  %v2070_v13 = vmul.f32 -1.442695, %v723_v20 }
 0x183   :  { %v2071_v9 = vmul.f32 -1.442695, %v725_v8  ;;  %v724_v56 = vadd.f32 %v717_v12, %v486_v37  ;;  %v3814_v12 = vld [vmem:[#allocation20_spill] sm:$0xff]  ;;  %v3821_v8 = vld [vmem:[#allocation25_spill] sm:$0xff] }
 0x184   :  { %2157 = vpow2.f32 %v2070_v13  ;;  %v3815_v13 = vld [vmem:[#allocation19_spill] sm:$0xff]  ;;  %v3822_v37 = vld [vmem:[#allocation28_spill] sm:$0xff] }
 0x185   :  { %2159 = vpow2.f32 %v2071_v9  ;;  %v3823_v9 = vld [vmem:[#allocation27_spill] sm:$0xff] }
 0x18f   :  { %v2156_v14 = vpop.eup %2155 }
 0x190   :  { %v729_v27 = vadd.f32 1.0, %v2156_v14  ;;  %v3824_v14 = vld [vmem:[#allocation30_spill] sm:$0xff] }
 0x191   :  { %v2158_v21 = vpop.eup %2157 }
 0x192   :  { %2161 = vrcp.f32 %v729_v27  ;;  %v735_v49 = vadd.f32 1.0, %v2158_v21  ;;  %v2160_v26 = vpop.eup %2159  ;;  %v3826_v27 = vld [vmem:[#allocation32_spill] sm:$0xff]  ;;  %v3827_v21 = vld [vmem:[#allocation31_spill] sm:$0xff] }
 0x193   :  { %2163 = vtanh.f32 %v724_v56  ;;  %v742_v42 = vadd.f32 1.0, %v2160_v26  ;;  %v3825_v56 = vld [vmem:[#allocation29_spill] sm:$0xff] }
 0x194   :  { %2165 = vrcp.f32 %v735_v49  ;;  %v3828_v49 = vmov 0.0   ;;  %v3829_v26 = vld [vmem:[#allocation33_spill] sm:$0xff] }
 0x195   :  { %2167 = vrcp.f32 %v742_v42  ;;  %v3832_v42 = vld [vmem:[#allocation34_spill] sm:$0xff] }
 0x19f   :  { %v2162_v62 = vpop.eup %2161 }
 0x1a0   :  { %v2164_v16 = vpop.eup %2163 }
 0x1a1   :  { %v2166_v17 = vpop.eup %2165  ;;  %v746_v1 = vmul.f32 %v2164_v16, %v2162_v62  ;;  %v3042_v62 = vld [vmem:[#allocation2 + $0x1e8] sm:$0xff]  ;;  %v3045_v16 = vld [vmem:[#allocation2 + $0x1f8] sm:$0xff] }
 0x1a2   :  { %v745_v40 = vmul.f32 0.0, %v2166_v17  ;;  %v2168_v18 = vpop.eup %2167 }
 0x1a4   :  { %v2975_v23 = vadd.f32 %v746_v1, %v745_v40 }
 0x1a6   :  { %2169 = vtanh.f32 %v2975_v23 }
 0x1b3   :  { %v2170_v20 = vpop.eup %2169 }
 0x1b4   :  { %v749_v30 = vmul.f32 %v2170_v20, %v2168_v18  ;;  %v3833_v20 = vld [vmem:[#allocation36_spill] sm:$0xff] }
 0x1b6   :  { %815 = vmatmul.mubr.f32.vlgmr.msra.gmra.mxu0 %v749_v30  ;;  %886 = vmatmul.mubr.f32.vlgmr.msra.gmra.mxu1 %v749_v30 }
 0x1b7   :  { %921 = vmatpush1.msra.mxu0 %v2511_v31  ;;  %992 = vmatpush1.msra.mxu1 %v2513_v32  ;;  %v3800_v31 = vld [vmem:[#allocation6_spill] sm:$0xff]  ;;  %v3801_v32 = vld [vmem:[#allocation5_spill] sm:$0xff] }
 0x1b8   :  { %922 = vmatprep.subr.mxu0 %v2516_v34  ;;  %993 = vmatprep.subr.mxu1 %v2518_v35  ;;  %v3802_v34 = vld [vmem:[#allocation8_spill] sm:$0xff]  ;;  %v3803_v35 = vld [vmem:[#allocation7_spill] sm:$0xff]  ;;  %3830 = vst [vmem:[#allocation6_spill] sm:$0xff] %v3042_v62  ;;  %3831 = vst [vmem:[#allocation5_spill] sm:$0xff] %v3045_v16 }
 0x1b9   :  { %923 = vmatpush1.msra.mxu0 %v2522_v36  ;;  %994 = vmatpush1.msra.mxu1 %v2531_v39  ;;  %v3804_v36 = vld [vmem:[#allocation10_spill] sm:$0xff]  ;;  %v3806_v39 = vld [vmem:[#allocation12_spill] sm:$0xff] }
 0x1ba   :  { %924 = vmatprep.subr.mxu0 %v2526_v38  ;;  %995 = vmatprep.subr.mxu1 %v2540_v43  ;;  %v3805_v38 = vld [vmem:[#allocation9_spill] sm:$0xff]  ;;  %v3808_v43 = vld [vmem:[#allocation14_spill] sm:$0xff] }
 0x1bb   :  { %925 = vmatpush1.msra.mxu0 %v2536_v41  ;;  %996 = vmatpush1.msra.mxu1 %v2547_v45  ;;  %v3807_v41 = vld [vmem:[#allocation11_spill] sm:$0xff]  ;;  %v3810_v45 = vld [vmem:[#allocation16_spill] sm:$0xff] }
 0x1bc   :  { %926 = vmatprep.subr.mxu0 %v2542_v44  ;;  %997 = vmatprep.subr.mxu1 %v2553_v47  ;;  %v3809_v44 = vld [vmem:[#allocation13_spill] sm:$0xff]  ;;  %v3812_v47 = vld [vmem:[#allocation18_spill] sm:$0xff] }
 0x1bd   :  { %927 = vmatpush1.msra.mxu0 %v2549_v46  ;;  %998 = vmatpush1.msra.mxu1 %v2562_v50  ;;  %v3811_v46 = vld [vmem:[#allocation15_spill] sm:$0xff] }
 0x1be   :  { %928 = vmatprep.subr.mxu0 %v2557_v48  ;;  %999 = vmatprep.subr.mxu1 %v2570_v52  ;;  %v3813_v48 = vld [vmem:[#allocation17_spill] sm:$0xff] }
 0x1bf   :  { %929 = vmatpush1.msra.mxu0 %v2566_v51  ;;  %1000 = vmatpush1.msra.mxu1 %v2576_v54 }
 0x1c0   :  { %930 = vmatprep.subr.mxu0 %v2572_v53  ;;  %1001 = vmatprep.subr.mxu1 %v2582_v57 }
 0x1c1   :  { %931 = vmatpush1.msra.mxu0 %v2578_v55  ;;  %1002 = vmatpush1.msra.mxu1 %v2591_v59 }
 0x1c2   :  { %932 = vmatprep.subr.mxu0 %v2587_v58  ;;  %1003 = vmatprep.subr.mxu1 %v2600_v63 }
 0x1c3   :  { %933 = vmatpush1.msra.mxu0 %v2595_v60  ;;  %1004 = vmatpush1.msra.mxu1 %v2606_v2 }
 0x1c4   :  { %934 = vmatprep.subr.mxu0 %v2602_v0  ;;  %1005 = vmatprep.subr.mxu1 %v2612_v4 }
 0x1c5   :  { %935 = vmatpush1.msra.mxu0 %v2608_v3  ;;  %1006 = vmatpush1.msra.mxu1 %v2621_v6 }
 0x1c6   :  { %936 = vmatprep.subr.mxu0 %v2617_v5  ;;  %1007 = vmatprep.subr.mxu1 %v2630_v10 }
 0x1c7   :  { %937 = vmatpush1.msra.mxu0 %v2625_v7  ;;  %1008 = vmatpush1.msra.mxu1 %v3800_v31 }
 0x1c8   :  { %938 = vmatprep.subr.mxu0 %v3801_v32  ;;  %1009 = vmatprep.subr.mxu1 %v3802_v34 }
 0x1c9   :  { %939 = vmatpush1.msra.mxu0 %v3803_v35  ;;  %1010 = vmatpush1.msra.mxu1 %v3804_v36 }
 0x1ca   :  { %940 = vmatprep.subr.mxu0 %v3805_v38  ;;  %1011 = vmatprep.subr.mxu1 %v3806_v39 }
 0x1cb   :  { %941 = vmatpush1.msra.mxu0 %v3807_v41  ;;  %1012 = vmatpush1.msra.mxu1 %v3808_v43 }
 0x1cc   :  { %942 = vmatprep.subr.mxu0 %v3809_v44  ;;  %1013 = vmatprep.subr.mxu1 %v3810_v45 }
 0x1cd   :  { %943 = vmatpush1.msra.mxu0 %v3811_v46  ;;  %1014 = vmatpush1.msra.mxu1 %v3812_v47 }
 0x1ce   :  { %944 = vmatprep.subr.mxu0 %v3813_v48  ;;  %1015 = vmatprep.subr.mxu1 %v3814_v12 }
 0x1cf   :  { %945 = vmatpush1.msra.mxu0 %v3815_v13  ;;  %1016 = vmatpush1.msra.mxu1 %v3816_v24 }
 0x1d0   :  { %946 = vmatprep.subr.mxu0 %v3817_v61  ;;  %1017 = vmatprep.subr.mxu1 %v3818_v28 }
 0x1d1   :  { %947 = vmatpush1.msra.mxu0 %v3819_v22  ;;  %1018 = vmatpush1.msra.mxu1 %v3820_v11 }
 0x1d2   :  { %948 = vmatprep.subr.mxu0 %v3821_v8  ;;  %1019 = vmatprep.subr.mxu1 %v3822_v37 }
 0x1d3   :  { %949 = vmatpush1.msra.mxu0 %v3823_v9  ;;  %1020 = vmatpush1.msra.mxu1 %v3824_v14 }
 0x1d4   :  { %950 = vmatprep.subr.mxu0 %v3825_v56  ;;  %1021 = vmatprep.subr.mxu1 %v3826_v27 }
 0x1d5   :  { %951 = vmatpush1.msra.mxu0 %v3827_v21  ;;  %984 = vmatprep.mubr.f32.mxu0 %v3828_v49 }
 0x1d6   :  { %1022 = vmatpush1.msra.mxu1 %v3829_v26  ;;  %1055 = vmatprep.mubr.f32.mxu1 %v3828_v49  ;;  %v3835_v26 = vld [vmem:[#allocation35_spill] sm:$0xff] }
 0x1d7   :  { %1090 = vmatprep.subr.mxu0 %v3042_v62  ;;  %1161 = vmatprep.subr.mxu1 %v3045_v16 }
 0x276   :  { %v816_v17 = vpop.f32.mrf.mxu0  ;;  %v887_v29 = vpop.f32.mrf.mxu1 }
 0x277   :  { %v892_v40 = vadd.f32 %v816_v17, %v3832_v42  ;;  %v894_v62 = vadd.f32 %v887_v29, %v3835_v26  ;;  %v3068_v26 = vld [vmem:[#allocation2 + $0x1c0] sm:$0xff] }
 0x278   :  { %v818_v1 = vpop.f32.mrf.mxu0  ;;  %v889_v33 = vpop.f32.mrf.mxu1 }
 0x279   :  { %v2072_v18 = vmul.f32 -1.442695, %v892_v40  ;;  %v893_v30 = vadd.f32 %v818_v1, %v3833_v20  ;;  %v895_v19 = vadd.f32 %v889_v33, %v3834_v25 }
 0x27b   :  { %2171 = vpow2.f32 %v2072_v18  ;;  %v2073_v15 = vmul.f32 -1.442695, %v893_v30  ;;  %v2074_v49 = vmul.f32 -1.442695, %v895_v19 }
 0x27d   :  { %2173 = vpow2.f32 %v2073_v15 }
 0x27e   :  { %2175 = vtanh.f32 %v894_v62  ;;  %v3071_v62 = vld [vmem:[#allocation2 + $0x1d0] sm:$0xff] }
 0x27f   :  { %2177 = vpow2.f32 %v2074_v49  ;;  %v3062_v49 = vld [vmem:[#allocation2 + $0x1c8] sm:$0xff] }
 0x288   :  { %v2172_v21 = vpop.eup %2171 }
 0x289   :  { %v899_v27 = vadd.f32 1.0, %v2172_v21  ;;  %v3059_v21 = vld [vmem:[#allocation2 + $0x1f0] sm:$0xff] }
 0x28a   :  { %v2174_v16 = vpop.eup %2173 }
 0x28b   :  { %2179 = vrcp.f32 %v899_v27  ;;  %v905_v17 = vadd.f32 1.0, %v2174_v16  ;;  %v2176_v42 = vpop.eup %2175  ;;  %v3056_v27 = vld [vmem:[#allocation2 + $0x1e0] sm:$0xff]  ;;  %v3074_v16 = vld [vmem:[#allocation2 + $0x1a8] sm:$0xff] }
 0x28c   :  { %v2178_v40 = vpop.eup %2177 }
 0x28d   :  { %2181 = vrcp.f32 %v905_v17  ;;  %v912_v15 = vadd.f32 1.0, %v2178_v40  ;;  %v3077_v17 = vld [vmem:[#allocation2 + $0x1b8] sm:$0xff]  ;;  %v3083_v40 = vld [vmem:[#allocation2 + $0x1b0] sm:$0xff] }
 0x28f   :  { %2183 = vrcp.f32 %v912_v15  ;;  %v3096_v15 = vld [vmem:[#allocation2 + $0x168] sm:$0xff] }
 0x298   :  { %v2180_v1 = vpop.eup %2179 }
 0x299   :  { %v916_v18 = vmul.f32 %v2180_v1, %v2176_v42  ;;  %v3080_v42 = vld [vmem:[#allocation2 + $0x1a0] sm:$0xff]  ;;  %v3086_v1 = vld [vmem:[#allocation2 + $0x188] sm:$0xff] }
 0x29a   :  { %v2182_v20 = vpop.eup %2181 }
 0x29b   :  { %v915_v30 = vmul.f32 %v2182_v20, %v2975_v23  ;;  %v3065_v23 = vld [vmem:[#allocation2 + $0x1d8] sm:$0xff]  ;;  %v3092_v20 = vld [vmem:[#allocation2 + $0x180] sm:$0xff] }
 0x29c   :  { %v2184_v19 = vpop.eup %2183 }
 0x29d   :  { %v3053_v25 = vadd.f32 %v916_v18, %v915_v30  ;;  %v3089_v18 = vld [vmem:[#allocation2 + $0x198] sm:$0xff] }
 0x29e   :  { %v3199_v30 = vld [vmem:[#allocation2 + $0x138] sm:$0xff] }
 0x29f   :  { %2185 = vtanh.f32 %v3053_v25 }
 0x2ac   :  { %v2186_v29 = vpop.eup %2185 }
 0x2ad   :  { %v919_v33 = vmul.f32 %v2186_v29, %v2184_v19  ;;  %v3205_v19 = vld [vmem:[#allocation2 + $0x130] sm:$0xff]  ;;  %v3208_v29 = vld [vmem:[#allocation2 + $0x108] sm:$0xff] }
 0x2af   :  { %985 = vmatmul.mubr.f32.vlgmr.msra.gmra.mxu0 %v919_v33  ;;  %1056 = vmatmul.mubr.f32.vlgmr.msra.gmra.mxu1 %v919_v33  ;;  %v3211_v33 = vld [vmem:[#allocation2 + $0x118] sm:$0xff] }
 0x2b0   :  { %1091 = vmatpush1.msra.mxu0 %v3056_v27  ;;  %1162 = vmatpush1.msra.mxu1 %v3059_v21 }
 0x2b1   :  { %1092 = vmatprep.subr.mxu0 %v3062_v49  ;;  %1163 = vmatprep.subr.mxu1 %v3065_v23 }
 0x2b2   :  { %1093 = vmatpush1.msra.mxu0 %v3068_v26  ;;  %1164 = vmatpush1.msra.mxu1 %v3071_v62 }
 0x2b3   :  { %1094 = vmatprep.subr.mxu0 %v3074_v16  ;;  %1165 = vmatprep.subr.mxu1 %v3077_v17 }
 0x2b4   :  { %1095 = vmatpush1.msra.mxu0 %v3080_v42  ;;  %1166 = vmatpush1.msra.mxu1 %v3083_v40 }
 0x2b5   :  { %1096 = vmatprep.subr.mxu0 %v3086_v1  ;;  %1167 = vmatprep.subr.mxu1 %v3089_v18 }
 0x2b6   :  { %1097 = vmatpush1.msra.mxu0 %v3092_v20  ;;  %1168 = vmatpush1.msra.mxu1 %v2562_v50  ;;  %v3836_v50 = vld [vmem:[#allocation32_spill] sm:$0xff] }
 0x2b7   :  { %1098 = vmatprep.subr.mxu0 %v3096_v15  ;;  %1169 = vmatprep.subr.mxu1 %v2570_v52  ;;  %v3838_v52 = vmov 0.0  }
 0x2b8   :  { %1099 = vmatpush1.msra.mxu0 %v2566_v51  ;;  %1170 = vmatpush1.msra.mxu1 %v2576_v54  ;;  %v3837_v51 = vld [vmem:[#allocation31_spill] sm:$0xff]  ;;  %v3840_v54 = vld [vmem:[#allocation6_spill] sm:$0xff] }
 0x2b9   :  { %1100 = vmatprep.subr.mxu0 %v2572_v53  ;;  %1171 = vmatprep.subr.mxu1 %v2582_v57  ;;  %v3839_v53 = vld [vmem:[#allocation33_spill] sm:$0xff] }
 0x2ba   :  { %1101 = vmatpush1.msra.mxu0 %v2578_v55  ;;  %1172 = vmatpush1.msra.mxu1 %v2591_v59  ;;  %v3841_v55 = vld [vmem:[#allocation5_spill] sm:$0xff] }
 0x2bb   :  { %1102 = vmatprep.subr.mxu0 %v2587_v58  ;;  %1173 = vmatprep.subr.mxu1 %v2600_v63  ;;  %v3842_v58 = vld [vmem:[#allocation38_spill] sm:$0xff] }
 0x2bc   :  { %1103 = vmatpush1.msra.mxu0 %v2595_v60  ;;  %1174 = vmatpush1.msra.mxu1 %v2606_v2 }
 0x2bd   :  { %1104 = vmatprep.subr.mxu0 %v2602_v0  ;;  %1175 = vmatprep.subr.mxu1 %v2612_v4  ;;  %v3843_v0 = vld [vmem:[#allocation40_spill] sm:$0xff] }
 0x2be   :  { %1105 = vmatpush1.msra.mxu0 %v2608_v3  ;;  %1176 = vmatpush1.msra.mxu1 %v2621_v6  ;;  %v3844_v6 = vld [vmem:[#allocation41_spill] sm:$0xff] }
 0x2bf   :  { %1106 = vmatprep.subr.mxu0 %v2617_v5  ;;  %1177 = vmatprep.subr.mxu1 %v2630_v10  ;;  %v3845_v10 = vld [vmem:[#allocation39_spill] sm:$0xff] }
 0x2c0   :  { %1107 = vmatpush1.msra.mxu0 %v2625_v7  ;;  %1178 = vmatpush1.msra.mxu1 %v3800_v31 }
 0x2c1   :  { %1108 = vmatprep.subr.mxu0 %v3801_v32  ;;  %1179 = vmatprep.subr.mxu1 %v3802_v34 }
 0x2c2   :  { %1109 = vmatpush1.msra.mxu0 %v3803_v35  ;;  %1180 = vmatpush1.msra.mxu1 %v3804_v36 }
 0x2c3   :  { %1110 = vmatprep.subr.mxu0 %v3805_v38  ;;  %1181 = vmatprep.subr.mxu1 %v3806_v39 }
 0x2c4   :  { %1111 = vmatpush1.msra.mxu0 %v3807_v41  ;;  %1182 = vmatpush1.msra.mxu1 %v3808_v43 }
 0x2c5   :  { %1112 = vmatprep.subr.mxu0 %v3809_v44  ;;  %1183 = vmatprep.subr.mxu1 %v3810_v45 }
 0x2c6   :  { %1113 = vmatpush1.msra.mxu0 %v3811_v46  ;;  %1184 = vmatpush1.msra.mxu1 %v3812_v47 }
 0x2c7   :  { %1114 = vmatprep.subr.mxu0 %v3813_v48  ;;  %1185 = vmatprep.subr.mxu1 %v3814_v12 }
 0x2c8   :  { %1115 = vmatpush1.msra.mxu0 %v3815_v13  ;;  %1186 = vmatpush1.msra.mxu1 %v3816_v24 }
 0x2c9   :  { %1116 = vmatprep.subr.mxu0 %v3817_v61  ;;  %1187 = vmatprep.subr.mxu1 %v3818_v28  ;;  %v3171_v61 = vld [vmem:[#allocation2 + $0x190] sm:$0xff]  ;;  %v3175_v28 = vld [vmem:[#allocation2 + $0x178] sm:$0xff] }
 0x2ca   :  { %1117 = vmatpush1.msra.mxu0 %v3819_v22  ;;  %1188 = vmatpush1.msra.mxu1 %v3820_v11  ;;  %v3178_v22 = vld [vmem:[#allocation2 + $0x160] sm:$0xff]  ;;  %v3181_v11 = vld [vmem:[#allocation2 + $0x170] sm:$0xff] }
 0x2cb   :  { %1118 = vmatprep.subr.mxu0 %v3821_v8  ;;  %1189 = vmatprep.subr.mxu1 %v3822_v37  ;;  %v3184_v8 = vld [vmem:[#allocation2 + $0x148] sm:$0xff]  ;;  %v3187_v37 = vld [vmem:[#allocation2 + $0x158] sm:$0xff] }
 0x2cc   :  { %1119 = vmatpush1.msra.mxu0 %v3823_v9  ;;  %1190 = vmatpush1.msra.mxu1 %v3824_v14  ;;  %v3190_v9 = vld [vmem:[#allocation2 + $0x140] sm:$0xff]  ;;  %v3193_v14 = vld [vmem:[#allocation2 + $0x150] sm:$0xff] }
 0x2cd   :  { %1120 = vmatprep.subr.mxu0 %v3825_v56  ;;  %1191 = vmatprep.subr.mxu1 %v3836_v50  ;;  %v3196_v56 = vld [vmem:[#allocation2 + $0x128] sm:$0xff]  ;;  %v3214_v50 = vld [vmem:[#allocation2 + $0x100] sm:$0xff] }
 0x2ce   :  { %1121 = vmatpush1.msra.mxu0 %v3837_v51  ;;  %1154 = vmatprep.mubr.f32.mxu0 %v3838_v52  ;;  %v3217_v51 = vld [vmem:[#allocation2 + $0x110] sm:$0xff] }
 0x2cf   :  { %1192 = vmatpush1.msra.mxu1 %v3839_v53  ;;  %1225 = vmatprep.mubr.f32.mxu1 %v3838_v52  ;;  %v3220_v53 = vld [vmem:[#allocation2 + $0xe8] sm:$0xff] }
 0x2d0   :  { %1260 = vmatprep.subr.mxu0 %v3840_v54  ;;  %1331 = vmatprep.subr.mxu1 %v3841_v55 }
 0x36f   :  { %v986_v57 = vpop.f32.mrf.mxu0  ;;  %v1057_v3 = vpop.f32.mrf.mxu1 }
 0x370   :  { %v1062_v59 = vadd.f32 %v986_v57, %v3842_v58  ;;  %v1064_v31 = vadd.f32 %v1057_v3, %v3845_v10  ;;  %v3223_v57 = vld [vmem:[#allocation2 + $0xf8] sm:$0xff]  ;;  %v3226_v58 = vld [vmem:[#allocation2 + $0xe0] sm:$0xff]  ;;  %v3244_v3 = vld [vmem:[#allocation2 + $0xa8] sm:$0xff] }
 0x371   :  { %v988_v60 = vpop.f32.mrf.mxu0  ;;  %v1059_v5 = vpop.f32.mrf.mxu1  ;;  %v3259_v10 = vld [vmem:[#allocation2 + $0x98] sm:$0xff] }
 0x372   :  { %v2075_v63 = vmul.f32 -1.442695, %v1062_v59  ;;  %v1063_v2 = vadd.f32 %v988_v60, %v3843_v0  ;;  %v1065_v7 = vadd.f32 %v1059_v5, %v3844_v6  ;;  %v3229_v59 = vld [vmem:[#allocation2 + $0xf0] sm:$0xff]  ;;  %v3232_v60 = vld [vmem:[#allocation2 + $0xc8] sm:$0xff]  ;;  %v3238_v0 = vld [vmem:[#allocation2 + $0xc0] sm:$0xff] }
 0x373   :  { %v3250_v5 = vld [vmem:[#allocation2 + $0xa0] sm:$0xff]  ;;  %v3253_v6 = vld [vmem:[#allocation2 + $0xb0] sm:$0xff] }
 0x374   :  { %2187 = vpow2.f32 %v2075_v63  ;;  %v2076_v4 = vmul.f32 -1.442695, %v1063_v2  ;;  %v2077_v32 = vmul.f32 -1.442695, %v1065_v7  ;;  %v3235_v63 = vld [vmem:[#allocation2 + $0xd8] sm:$0xff]  ;;  %v3241_v2 = vld [vmem:[#allocation2 + $0xd0] sm:$0xff] }
 0x375   :  { %v3256_v7 = vld [vmem:[#allocation2 + $0x88] sm:$0xff] }
 0x376   :  { %2189 = vpow2.f32 %v2076_v4  ;;  %v3247_v4 = vld [vmem:[#allocation2 + $0xb8] sm:$0xff] }
 0x377   :  { %2191 = vtanh.f32 %v1064_v31  ;;  %v3262_v31 = vld [vmem:[#allocation2 + $0x80] sm:$0xff] }
 0x378   :  { %2193 = vpow2.f32 %v2077_v32  ;;  %v3265_v32 = vld [vmem:[#allocation2 + $0x90] sm:$0xff] }
 0x379   :  { %3846 = vst [vmem:[#allocation8_spill] sm:$0xff] %v3265_v32 }
 0x381   :  { %v2188_v34 = vpop.eup %2187 }
 0x382   :  { %v1069_v35 = vadd.f32 1.0, %v2188_v34  ;;  %v3268_v34 = vld [vmem:[#allocation2 + $0x68] sm:$0xff] }
 0x383   :  { %v2190_v36 = vpop.eup %2189  ;;  %3847 = vst [vmem:[#allocation7_spill] sm:$0xff] %v3268_v34 }
 0x384   :  { %2195 = vrcp.f32 %v1069_v35  ;;  %v1075_v38 = vadd.f32 1.0, %v2190_v36  ;;  %v2192_v39 = vpop.eup %2191  ;;  %v3271_v35 = vld [vmem:[#allocation2 + $0x78] sm:$0xff]  ;;  %v3274_v36 = vld [vmem:[#allocation2 + $0x60] sm:$0xff] }
 0x385   :  { %v2194_v41 = vpop.eup %2193  ;;  %3848 = vst [vmem:[#allocation10_spill] sm:$0xff] %v3271_v35  ;;  %3849 = vst [vmem:[#allocation9_spill] sm:$0xff] %v3274_v36 }
 0x386   :  { %2197 = vrcp.f32 %v1075_v38  ;;  %v1082_v46 = vadd.f32 1.0, %v2194_v41  ;;  %v3277_v38 = vld [vmem:[#allocation2 + $0x70] sm:$0xff]  ;;  %v3283_v41 = vld [vmem:[#allocation2 + $0x58] sm:$0xff] }
 0x387   :  { %3850 = vst [vmem:[#allocation12_spill] sm:$0xff] %v3277_v38  ;;  %3852 = vst [vmem:[#allocation14_spill] sm:$0xff] %v3283_v41 }
 0x388   :  { %2199 = vrcp.f32 %v1082_v46  ;;  %v3295_v46 = vld [vmem:[#allocation2 + $0x38] sm:$0xff] }
 0x389   :  { %3856 = vst [vmem:[#allocation18_spill] sm:$0xff] %v3295_v46 }
 0x391   :  { %v2196_v43 = vpop.eup %2195 }
 0x392   :  { %v1086_v44 = vmul.f32 %v2196_v43, %v2192_v39  ;;  %v3280_v39 = vld [vmem:[#allocation2 + $0x48] sm:$0xff]  ;;  %v3286_v43 = vld [vmem:[#allocation2 + $0x40] sm:$0xff] }
 0x393   :  { %v2198_v45 = vpop.eup %2197  ;;  %3851 = vst [vmem:[#allocation11_spill] sm:$0xff] %v3280_v39  ;;  %3853 = vst [vmem:[#allocation13_spill] sm:$0xff] %v3286_v43 }
 0x394   :  { %v1085_v47 = vmul.f32 %v2198_v45, %v3053_v25  ;;  %v3202_v25 = vld [vmem:[#allocation2 + $0x120] sm:$0xff]  ;;  %v3292_v45 = vld [vmem:[#allocation2 + $0x28] sm:$0xff] }
 0x395   :  { %v2200_v12 = vpop.eup %2199  ;;  %3855 = vst [vmem:[#allocation15_spill] sm:$0xff] %v3292_v45 }
 0x396   :  { %v3155_v48 = vadd.f32 %v1086_v44, %v1085_v47  ;;  %v3289_v44 = vld [vmem:[#allocation2 + $0x50] sm:$0xff]  ;;  %v3298_v47 = vld [vmem:[#allocation2 + $0x20] sm:$0xff] }
 0x397   :  { %3854 = vst [vmem:[#allocation16_spill] sm:$0xff] %v3289_v44  ;;  %3857 = vst [vmem:[#allocation17_spill] sm:$0xff] %v3298_v47 }
 0x398   :  { %2201 = vtanh.f32 %v3155_v48 }
 0x3a5   :  { %v2202_v13 = vpop.eup %2201 }
 0x3a6   :  { %v1089_v24 = vmul.f32 %v2202_v13, %v2200_v12  ;;  %v3301_v12 = vld [vmem:[#allocation2 + $0x30] sm:$0xff]  ;;  %v3304_v13 = vld [vmem:[#allocation2 + $0x8] sm:$0xff] }
 0x3a7   :  { %3858 = vst [vmem:[#allocation20_spill] sm:$0xff] %v3301_v12  ;;  %3859 = vst [vmem:[#allocation19_spill] sm:$0xff] %v3304_v13 }
 0x3a8   :  { %1155 = vmatmul.mubr.f32.vlgmr.msra.gmra.mxu0 %v1089_v24  ;;  %1226 = vmatmul.mubr.f32.vlgmr.msra.gmra.mxu1 %v1089_v24  ;;  %v3307_v24 = vld [vmem:[#allocation2 + $0x18] sm:$0xff] }
 0x3a9   :  { %1261 = vmatpush1.msra.mxu0 %v3056_v27  ;;  %1332 = vmatpush1.msra.mxu1 %v3059_v21  ;;  %3860 = vst [vmem:[#allocation22_spill] sm:$0xff] %v3307_v24 }
 0x3aa   :  { %1262 = vmatprep.subr.mxu0 %v3062_v49  ;;  %1333 = vmatprep.subr.mxu1 %v3065_v23 }
 0x3ab   :  { %1263 = vmatpush1.msra.mxu0 %v3068_v26  ;;  %1334 = vmatpush1.msra.mxu1 %v3071_v62 }
 0x3ac   :  { %1264 = vmatprep.subr.mxu0 %v3074_v16  ;;  %1335 = vmatprep.subr.mxu1 %v3077_v17 }
 0x3ad   :  { %1265 = vmatpush1.msra.mxu0 %v3080_v42  ;;  %1336 = vmatpush1.msra.mxu1 %v3083_v40 }
 0x3ae   :  { %1266 = vmatprep.subr.mxu0 %v3086_v1  ;;  %1337 = vmatprep.subr.mxu1 %v3089_v18 }
 0x3af   :  { %1267 = vmatpush1.msra.mxu0 %v3092_v20  ;;  %1338 = vmatpush1.msra.mxu1 %v3171_v61 }
 0x3b0   :  { %1268 = vmatprep.subr.mxu0 %v3096_v15  ;;  %1339 = vmatprep.subr.mxu1 %v3175_v28 }
 0x3b1   :  { %1269 = vmatpush1.msra.mxu0 %v3178_v22  ;;  %1340 = vmatpush1.msra.mxu1 %v3181_v11 }
 0x3b2   :  { %1270 = vmatprep.subr.mxu0 %v3184_v8  ;;  %1341 = vmatprep.subr.mxu1 %v3187_v37 }
 0x3b3   :  { %1271 = vmatpush1.msra.mxu0 %v3190_v9  ;;  %1342 = vmatpush1.msra.mxu1 %v3193_v14 }
 0x3b4   :  { %1272 = vmatprep.subr.mxu0 %v3196_v56  ;;  %1343 = vmatprep.subr.mxu1 %v3199_v30 }
 0x3b5   :  { %1273 = vmatpush1.msra.mxu0 %v3202_v25  ;;  %1344 = vmatpush1.msra.mxu1 %v3205_v19 }
 0x3b6   :  { %1274 = vmatprep.subr.mxu0 %v3208_v29  ;;  %1345 = vmatprep.subr.mxu1 %v3211_v33 }
 0x3b7   :  { %1275 = vmatpush1.msra.mxu0 %v3214_v50  ;;  %1346 = vmatpush1.msra.mxu1 %v3217_v51 }
 0x3b8   :  { %1276 = vmatprep.subr.mxu0 %v3220_v53  ;;  %1347 = vmatprep.subr.mxu1 %v3223_v57 }
 0x3b9   :  { %1277 = vmatpush1.msra.mxu0 %v3226_v58  ;;  %1348 = vmatpush1.msra.mxu1 %v3229_v59 }
 0x3ba   :  { %1278 = vmatprep.subr.mxu0 %v3232_v60  ;;  %1349 = vmatprep.subr.mxu1 %v3235_v63 }
 0x3bb   :  { %1279 = vmatpush1.msra.mxu0 %v3238_v0  ;;  %1350 = vmatpush1.msra.mxu1 %v3241_v2 }
 0x3bc   :  { %1280 = vmatprep.subr.mxu0 %v3244_v3  ;;  %1351 = vmatprep.subr.mxu1 %v3247_v4 }
 0x3bd   :  { %1281 = vmatpush1.msra.mxu0 %v3250_v5  ;;  %1352 = vmatpush1.msra.mxu1 %v3253_v6 }
 0x3be   :  { %1282 = vmatprep.subr.mxu0 %v3256_v7  ;;  %1353 = vmatprep.subr.mxu1 %v3259_v10 }
 0x3bf   :  { %1283 = vmatpush1.msra.mxu0 %v3262_v31  ;;  %1354 = vmatpush1.msra.mxu1 %v3265_v32 }
 0x3c0   :  { %1284 = vmatprep.subr.mxu0 %v3268_v34  ;;  %1355 = vmatprep.subr.mxu1 %v3271_v35  ;;  %v3866_v35 = vld [vmem:[#allocation43_spill] sm:$0xff] }
 0x3c1   :  { %1285 = vmatpush1.msra.mxu0 %v3274_v36  ;;  %1356 = vmatpush1.msra.mxu1 %v3277_v38  ;;  %v3865_v36 = vld [vmem:[#allocation45_spill] sm:$0xff] }
 0x3c2   :  { %1286 = vmatprep.subr.mxu0 %v3280_v39  ;;  %1357 = vmatprep.subr.mxu1 %v3283_v41 }
 0x3c3   :  { %1287 = vmatpush1.msra.mxu0 %v3286_v43  ;;  %1358 = vmatpush1.msra.mxu1 %v3289_v44  ;;  %v3864_v43 = vld [vmem:[#allocation44_spill] sm:$0xff] }
 0x3c4   :  { %1288 = vmatprep.subr.mxu0 %v3292_v45  ;;  %1359 = vmatprep.subr.mxu1 %v3295_v46  ;;  %v3310_v45 = vld [vmem:[#allocation2] sm:$0xff]  ;;  %v3314_v46 = vld [vmem:[#allocation2 + $0x10] sm:$0xff] }
 0x3c5   :  { %1289 = vmatpush1.msra.mxu0 %v3298_v47  ;;  %1360 = vmatpush1.msra.mxu1 %v3301_v12  ;;  %3861 = vst [vmem:[#allocation21_spill] sm:$0xff] %v3310_v45  ;;  %3862 = vst [vmem:[#allocation24_spill] sm:$0xff] %v3314_v46  ;;  %v3863_v12 = vld [vmem:[#allocation42_spill] sm:$0xff] }
 0x3c6   :  { %1290 = vmatprep.subr.mxu0 %v3304_v13  ;;  %1361 = vmatprep.subr.mxu1 %v3307_v24 }
 0x3c7   :  { %1291 = vmatpush1.msra.mxu0 %v3310_v45  ;;  %1324 = vmatprep.mubr.f32.mxu0 %v3838_v52 }
 0x3c8   :  { %1362 = vmatpush1.msra.mxu1 %v3314_v46  ;;  %1395 = vmatprep.mubr.f32.mxu1 %v3838_v52 }
 0x3c9   :  { %1430 = vmatprep.subr.mxu0 %v3840_v54  ;;  %1501 = vmatprep.subr.mxu1 %v3841_v55 }
 0x468   :  { %v1156_v13 = vpop.f32.mrf.mxu0  ;;  %v1227_v45 = vpop.f32.mrf.mxu1 }
 0x469   :  { %v1232_v47 = vadd.f32 %v1156_v13, %v3863_v12  ;;  %v1234_v52 = vadd.f32 %v1227_v45, %v3866_v35  ;;  %v3872_v45 = vld [vmem:[#allocation11_spill] sm:$0xff] }
 0x46a   :  { %v1158_v24 = vpop.f32.mrf.mxu0  ;;  %v1229_v38 = vpop.f32.mrf.mxu1 }
 0x46b   :  { %v2078_v44 = vmul.f32 -1.442695, %v1232_v47  ;;  %v1233_v41 = vadd.f32 %v1158_v24, %v3864_v43  ;;  %v1235_v46 = vadd.f32 %v1229_v38, %v3865_v36  ;;  %v3871_v38 = vld [vmem:[#allocation12_spill] sm:$0xff] }
 0x46d   :  { %2203 = vpow2.f32 %v2078_v44  ;;  %v2079_v39 = vmul.f32 -1.442695, %v1233_v41  ;;  %v2080_v34 = vmul.f32 -1.442695, %v1235_v46  ;;  %v3873_v46 = vld [vmem:[#allocation14_spill] sm:$0xff] }
 0x46f   :  { %2205 = vpow2.f32 %v2079_v39 }
 0x470   :  { %2207 = vtanh.f32 %v1234_v52 }
 0x471   :  { %2209 = vpow2.f32 %v2080_v34  ;;  %v3870_v34 = vld [vmem:[#allocation9_spill] sm:$0xff] }
 0x47a   :  { %v2204_v54 = vpop.eup %2203 }
 0x47b   :  { %v1239_v32 = vadd.f32 1.0, %v2204_v54 }
 0x47c   :  { %v2206_v55 = vpop.eup %2205 }
 0x47d   :  { %2211 = vrcp.f32 %v1239_v32  ;;  %v1245_v12 = vadd.f32 1.0, %v2206_v55  ;;  %v2208_v47 = vpop.eup %2207  ;;  %v3867_v55 = vld [vmem:[#allocation8_spill] sm:$0xff]  ;;  %v3869_v32 = vld [vmem:[#allocation10_spill] sm:$0xff] }
 0x47e   :  { %v2210_v43 = vpop.eup %2209 }
 0x47f   :  { %2213 = vrcp.f32 %v1245_v12  ;;  %v1252_v39 = vadd.f32 1.0, %v2210_v43  ;;  %v3874_v12 = vld [vmem:[#allocation13_spill] sm:$0xff]  ;;  %v3876_v43 = vld [vmem:[#allocation15_spill] sm:$0xff] }
 0x481   :  { %2215 = vrcp.f32 %v1252_v39  ;;  %v3880_v39 = vld [vmem:[#allocation19_spill] sm:$0xff] }
 0x48a   :  { %v2212_v44 = vpop.eup %2211 }
 0x48b   :  { %v1256_v13 = vmul.f32 %v2212_v44, %v2208_v47  ;;  %v3875_v47 = vld [vmem:[#allocation16_spill] sm:$0xff]  ;;  %v3877_v44 = vld [vmem:[#allocation18_spill] sm:$0xff] }
 0x48c   :  { %v2214_v41 = vpop.eup %2213 }
 0x48d   :  { %v1255_v24 = vmul.f32 %v2214_v41, %v3155_v48  ;;  %v3868_v48 = vld [vmem:[#allocation7_spill] sm:$0xff]  ;;  %v3879_v41 = vld [vmem:[#allocation20_spill] sm:$0xff] }
 0x48e   :  { %v2216_v54 = vpop.eup %2215 }
 0x48f   :  { %v3325_v36 = vadd.f32 %v1256_v13, %v1255_v24  ;;  %v3878_v13 = vld [vmem:[#allocation17_spill] sm:$0xff]  ;;  %v3881_v24 = vld [vmem:[#allocation22_spill] sm:$0xff] }
 0x491   :  { %2217 = vtanh.f32 %v3325_v36 }
 0x49e   :  { %v2218_v52 = vpop.eup %2217 }
 0x49f   :  { %v1259_v35 = vmul.f32 %v2218_v52, %v2216_v54  ;;  %v3882_v54 = vld [vmem:[#allocation21_spill] sm:$0xff]  ;;  %v3883_v52 = vmov 0.0  }
 0x4a1   :  { %1325 = vmatmul.mubr.f32.vlgmr.msra.gmra.mxu0 %v1259_v35  ;;  %1396 = vmatmul.mubr.f32.vlgmr.msra.gmra.mxu1 %v1259_v35  ;;  %v3884_v35 = vld [vmem:[#allocation24_spill] sm:$0xff] }
 0x4a2   :  { %1431 = vmatpush1.msra.mxu0 %v3056_v27  ;;  %1502 = vmatpush1.msra.mxu1 %v3059_v21 }
 0x4a3   :  { %1432 = vmatprep.subr.mxu0 %v3062_v49  ;;  %1503 = vmatprep.subr.mxu1 %v3065_v23 }
 0x4a4   :  { %1433 = vmatpush1.msra.mxu0 %v3068_v26  ;;  %1504 = vmatpush1.msra.mxu1 %v3071_v62 }
 0x4a5   :  { %1434 = vmatprep.subr.mxu0 %v3074_v16  ;;  %1505 = vmatprep.subr.mxu1 %v3077_v17 }
 0x4a6   :  { %1435 = vmatpush1.msra.mxu0 %v3080_v42  ;;  %1506 = vmatpush1.msra.mxu1 %v3083_v40 }
 0x4a7   :  { %1436 = vmatprep.subr.mxu0 %v3086_v1  ;;  %1507 = vmatprep.subr.mxu1 %v3089_v18 }
 0x4a8   :  { %1437 = vmatpush1.msra.mxu0 %v3092_v20  ;;  %1508 = vmatpush1.msra.mxu1 %v3171_v61 }
 0x4a9   :  { %1438 = vmatprep.subr.mxu0 %v3096_v15  ;;  %1509 = vmatprep.subr.mxu1 %v3175_v28 }
 0x4aa   :  { %1439 = vmatpush1.msra.mxu0 %v3178_v22  ;;  %1510 = vmatpush1.msra.mxu1 %v3181_v11 }
 0x4ab   :  { %1440 = vmatprep.subr.mxu0 %v3184_v8  ;;  %1511 = vmatprep.subr.mxu1 %v3187_v37 }
 0x4ac   :  { %1441 = vmatpush1.msra.mxu0 %v3190_v9  ;;  %1512 = vmatpush1.msra.mxu1 %v3193_v14 }
 0x4ad   :  { %1442 = vmatprep.subr.mxu0 %v3196_v56  ;;  %1513 = vmatprep.subr.mxu1 %v3199_v30 }
 0x4ae   :  { %1443 = vmatpush1.msra.mxu0 %v3202_v25  ;;  %1514 = vmatpush1.msra.mxu1 %v3205_v19 }
 0x4af   :  { %1444 = vmatprep.subr.mxu0 %v3208_v29  ;;  %1515 = vmatprep.subr.mxu1 %v3211_v33 }
 0x4b0   :  { %1445 = vmatpush1.msra.mxu0 %v3214_v50  ;;  %1516 = vmatpush1.msra.mxu1 %v3217_v51 }
 0x4b1   :  { %1446 = vmatprep.subr.mxu0 %v3220_v53  ;;  %1517 = vmatprep.subr.mxu1 %v3223_v57 }
 0x4b2   :  { %1447 = vmatpush1.msra.mxu0 %v3226_v58  ;;  %1518 = vmatpush1.msra.mxu1 %v3229_v59 }
 0x4b3   :  { %1448 = vmatprep.subr.mxu0 %v3232_v60  ;;  %1519 = vmatprep.subr.mxu1 %v3235_v63 }
 0x4b4   :  { %1449 = vmatpush1.msra.mxu0 %v3238_v0  ;;  %1520 = vmatpush1.msra.mxu1 %v3241_v2 }
 0x4b5   :  { %1450 = vmatprep.subr.mxu0 %v3244_v3  ;;  %1521 = vmatprep.subr.mxu1 %v3247_v4 }
 0x4b6   :  { %1451 = vmatpush1.msra.mxu0 %v3250_v5  ;;  %1522 = vmatpush1.msra.mxu1 %v3253_v6 }
 0x4b7   :  { %1452 = vmatprep.subr.mxu0 %v3256_v7  ;;  %1523 = vmatprep.subr.mxu1 %v3259_v10 }
 0x4b8   :  { %1453 = vmatpush1.msra.mxu0 %v3262_v31  ;;  %1524 = vmatpush1.msra.mxu1 %v3867_v55 }
 0x4b9   :  { %1454 = vmatprep.subr.mxu0 %v3868_v48  ;;  %1525 = vmatprep.subr.mxu1 %v3869_v32  ;;  %v3890_v32 = vld [vmem:[#allocation47_spill] sm:$0xff] }
 0x4ba   :  { %1455 = vmatpush1.msra.mxu0 %v3870_v34  ;;  %1526 = vmatpush1.msra.mxu1 %v3871_v38  ;;  %v3889_v34 = vld [vmem:[#allocation49_spill] sm:$0xff] }
 0x4bb   :  { %1456 = vmatprep.subr.mxu0 %v3872_v45  ;;  %1527 = vmatprep.subr.mxu1 %v3873_v46 }
 0x4bc   :  { %1457 = vmatpush1.msra.mxu0 %v3874_v12  ;;  %1528 = vmatpush1.msra.mxu1 %v3875_v47  ;;  %v3885_v47 = vld [vmem:[#allocation6_spill] sm:$0xff] }
 0x4bd   :  { %1458 = vmatprep.subr.mxu0 %v3876_v43  ;;  %1529 = vmatprep.subr.mxu1 %v3877_v44  ;;  %v3886_v43 = vld [vmem:[#allocation5_spill] sm:$0xff] }
 0x4be   :  { %1459 = vmatpush1.msra.mxu0 %v3878_v13  ;;  %1530 = vmatpush1.msra.mxu1 %v3879_v41  ;;  %v3887_v13 = vld [vmem:[#allocation46_spill] sm:$0xff] }
 0x4bf   :  { %1460 = vmatprep.subr.mxu0 %v3880_v39  ;;  %1531 = vmatprep.subr.mxu1 %v3881_v24  ;;  %v3888_v39 = vld [vmem:[#allocation48_spill] sm:$0xff] }
 0x4c0   :  { %1461 = vmatpush1.msra.mxu0 %v3882_v54  ;;  %1494 = vmatprep.mubr.f32.mxu0 %v3883_v52 }
 0x4c1   :  { %1532 = vmatpush1.msra.mxu1 %v3884_v35  ;;  %1565 = vmatprep.mubr.f32.mxu1 %v3883_v52 }
 0x4c2   :  { %1600 = vmatprep.subr.mxu0 %v3885_v47  ;;  %1671 = vmatprep.subr.mxu1 %v3886_v43 }
 0x561   :  { %v1326_v44 = vpop.f32.mrf.mxu0  ;;  %v1397_v24 = vpop.f32.mrf.mxu1 }
 0x562   :  { %v1402_v12 = vadd.f32 %v1326_v44, %v3887_v13  ;;  %v1404_v52 = vadd.f32 %v1397_v24, %v3890_v32  ;;  %v3895_v24 = vld [vmem:[#allocation12_spill] sm:$0xff] }
 0x563   :  { %v1328_v41 = vpop.f32.mrf.mxu0  ;;  %v1399_v38 = vpop.f32.mrf.mxu1 }
 0x564   :  { %v2081_v46 = vmul.f32 -1.442695, %v1402_v12  ;;  %v1403_v45 = vadd.f32 %v1328_v41, %v3888_v39  ;;  %v1405_v35 = vadd.f32 %v1399_v38, %v3889_v34 }
 0x566   :  { %2219 = vpow2.f32 %v2081_v46  ;;  %v2082_v54 = vmul.f32 -1.442695, %v1403_v45  ;;  %v2083_v48 = vmul.f32 -1.442695, %v1405_v35  ;;  %v3897_v35 = vld [vmem:[#allocation14_spill] sm:$0xff] }
 0x568   :  { %2221 = vpow2.f32 %v2082_v54 }
 0x569   :  { %2223 = vtanh.f32 %v1404_v52  ;;  %v3896_v52 = vld [vmem:[#allocation11_spill] sm:$0xff] }
 0x56a   :  { %2225 = vpow2.f32 %v2083_v48  ;;  %v3893_v48 = vld [vmem:[#allocation10_spill] sm:$0xff] }
 0x573   :  { %v2220_v47 = vpop.eup %2219 }
 0x574   :  { %v1409_v55 = vadd.f32 1.0, %v2220_v47 }
 0x575   :  { %v2222_v43 = vpop.eup %2221 }
 0x576   :  { %2227 = vrcp.f32 %v1409_v55  ;;  %v1415_v44 = vadd.f32 1.0, %v2222_v43  ;;  %v2224_v12 = vpop.eup %2223  ;;  %v3892_v55 = vld [vmem:[#allocation7_spill] sm:$0xff]  ;;  %v3894_v43 = vld [vmem:[#allocation9_spill] sm:$0xff] }
 0x577   :  { %v2226_v13 = vpop.eup %2225 }
 0x578   :  { %2229 = vrcp.f32 %v1415_v44  ;;  %v1422_v39 = vadd.f32 1.0, %v2226_v13  ;;  %v3898_v44 = vld [vmem:[#allocation13_spill] sm:$0xff]  ;;  %v3900_v13 = vld [vmem:[#allocation15_spill] sm:$0xff] }
 0x57a   :  { %2231 = vrcp.f32 %v1422_v39  ;;  %v3904_v39 = vld [vmem:[#allocation19_spill] sm:$0xff] }
 0x583   :  { %v2228_v46 = vpop.eup %2227 }
 0x584   :  { %v1426_v41 = vmul.f32 %v2228_v46, %v2224_v12  ;;  %v3899_v12 = vld [vmem:[#allocation16_spill] sm:$0xff]  ;;  %v3901_v46 = vld [vmem:[#allocation18_spill] sm:$0xff] }
 0x585   :  { %v2230_v45 = vpop.eup %2229 }
 0x586   :  { %v1425_v54 = vmul.f32 %v2230_v45, %v3325_v36  ;;  %v3891_v36 = vld [vmem:[#allocation8_spill] sm:$0xff] }
 0x587   :  { %v2232_v32 = vpop.eup %2231  ;;  %v3903_v45 = vld [vmem:[#allocation20_spill] sm:$0xff] }
 0x588   :  { %v3399_v34 = vadd.f32 %v1426_v41, %v1425_v54  ;;  %v3902_v41 = vld [vmem:[#allocation17_spill] sm:$0xff]  ;;  %v3905_v54 = vld [vmem:[#allocation22_spill] sm:$0xff] }
 0x58a   :  { %2233 = vtanh.f32 %v3399_v34 }
 0x597   :  { %v2234_v38 = vpop.eup %2233 }
 0x598   :  { %v1429_v47 = vmul.f32 %v2234_v38, %v2232_v32  ;;  %v3906_v32 = vld [vmem:[#allocation21_spill] sm:$0xff]  ;;  %v3907_v38 = vmov 0.0  }
 0x59a   :  { %1495 = vmatmul.mubr.f32.vlgmr.msra.gmra.mxu0 %v1429_v47  ;;  %1566 = vmatmul.mubr.f32.vlgmr.msra.gmra.mxu1 %v1429_v47  ;;  %v3908_v47 = vld [vmem:[#allocation24_spill] sm:$0xff] }
 0x59b   :  { %1601 = vmatpush1.msra.mxu0 %v3056_v27  ;;  %1672 = vmatpush1.msra.mxu1 %v3059_v21 }
 0x59c   :  { %1602 = vmatprep.subr.mxu0 %v3062_v49  ;;  %1673 = vmatprep.subr.mxu1 %v3065_v23 }
 0x59d   :  { %1603 = vmatpush1.msra.mxu0 %v3068_v26  ;;  %1674 = vmatpush1.msra.mxu1 %v3071_v62 }
 0x59e   :  { %1604 = vmatprep.subr.mxu0 %v3074_v16  ;;  %1675 = vmatprep.subr.mxu1 %v3077_v17 }
 0x59f   :  { %1605 = vmatpush1.msra.mxu0 %v3080_v42  ;;  %1676 = vmatpush1.msra.mxu1 %v3083_v40 }
 0x5a0   :  { %1606 = vmatprep.subr.mxu0 %v3086_v1  ;;  %1677 = vmatprep.subr.mxu1 %v3089_v18 }
 0x5a1   :  { %1607 = vmatpush1.msra.mxu0 %v3092_v20  ;;  %1678 = vmatpush1.msra.mxu1 %v3171_v61 }
 0x5a2   :  { %1608 = vmatprep.subr.mxu0 %v3096_v15  ;;  %1679 = vmatprep.subr.mxu1 %v3175_v28 }
 0x5a3   :  { %1609 = vmatpush1.msra.mxu0 %v3178_v22  ;;  %1680 = vmatpush1.msra.mxu1 %v3181_v11 }
 0x5a4   :  { %1610 = vmatprep.subr.mxu0 %v3184_v8  ;;  %1681 = vmatprep.subr.mxu1 %v3187_v37 }
 0x5a5   :  { %1611 = vmatpush1.msra.mxu0 %v3190_v9  ;;  %1682 = vmatpush1.msra.mxu1 %v3193_v14 }
 0x5a6   :  { %1612 = vmatprep.subr.mxu0 %v3196_v56  ;;  %1683 = vmatprep.subr.mxu1 %v3199_v30 }
 0x5a7   :  { %1613 = vmatpush1.msra.mxu0 %v3202_v25  ;;  %1684 = vmatpush1.msra.mxu1 %v3205_v19 }
 0x5a8   :  { %1614 = vmatprep.subr.mxu0 %v3208_v29  ;;  %1685 = vmatprep.subr.mxu1 %v3211_v33 }
 0x5a9   :  { %1615 = vmatpush1.msra.mxu0 %v3214_v50  ;;  %1686 = vmatpush1.msra.mxu1 %v3217_v51 }
 0x5aa   :  { %1616 = vmatprep.subr.mxu0 %v3220_v53  ;;  %1687 = vmatprep.subr.mxu1 %v3223_v57 }
 0x5ab   :  { %1617 = vmatpush1.msra.mxu0 %v3226_v58  ;;  %1688 = vmatpush1.msra.mxu1 %v3229_v59 }
 0x5ac   :  { %1618 = vmatprep.subr.mxu0 %v3232_v60  ;;  %1689 = vmatprep.subr.mxu1 %v3235_v63 }
 0x5ad   :  { %1619 = vmatpush1.msra.mxu0 %v3238_v0  ;;  %1690 = vmatpush1.msra.mxu1 %v3241_v2 }
 0x5ae   :  { %1620 = vmatprep.subr.mxu0 %v3244_v3  ;;  %1691 = vmatprep.subr.mxu1 %v3247_v4 }
 0x5af   :  { %1621 = vmatpush1.msra.mxu0 %v3250_v5  ;;  %1692 = vmatpush1.msra.mxu1 %v3253_v6 }
 0x5b0   :  { %1622 = vmatprep.subr.mxu0 %v3256_v7  ;;  %1693 = vmatprep.subr.mxu1 %v3259_v10 }
 0x5b1   :  { %1623 = vmatpush1.msra.mxu0 %v3262_v31  ;;  %1694 = vmatpush1.msra.mxu1 %v3891_v36 }
 0x5b2   :  { %1624 = vmatprep.subr.mxu0 %v3892_v55  ;;  %1695 = vmatprep.subr.mxu1 %v3893_v48  ;;  %v3914_v48 = vld [vmem:[#allocation51_spill] sm:$0xff] }
 0x5b3   :  { %1625 = vmatpush1.msra.mxu0 %v3894_v43  ;;  %1696 = vmatpush1.msra.mxu1 %v3895_v24  ;;  %v3913_v43 = vld [vmem:[#allocation53_spill] sm:$0xff] }
 0x5b4   :  { %1626 = vmatprep.subr.mxu0 %v3896_v52  ;;  %1697 = vmatprep.subr.mxu1 %v3897_v35 }
 0x5b5   :  { %1627 = vmatpush1.msra.mxu0 %v3898_v44  ;;  %1698 = vmatpush1.msra.mxu1 %v3899_v12  ;;  %v3909_v12 = vld [vmem:[#allocation6_spill] sm:$0xff] }
 0x5b6   :  { %1628 = vmatprep.subr.mxu0 %v3900_v13  ;;  %1699 = vmatprep.subr.mxu1 %v3901_v46  ;;  %v3910_v13 = vld [vmem:[#allocation5_spill] sm:$0xff] }
 0x5b7   :  { %1629 = vmatpush1.msra.mxu0 %v3902_v41  ;;  %1700 = vmatpush1.msra.mxu1 %v3903_v45  ;;  %v3911_v41 = vld [vmem:[#allocation50_spill] sm:$0xff] }
 0x5b8   :  { %1630 = vmatprep.subr.mxu0 %v3904_v39  ;;  %1701 = vmatprep.subr.mxu1 %v3905_v54  ;;  %v3912_v39 = vld [vmem:[#allocation52_spill] sm:$0xff] }
 0x5b9   :  { %1631 = vmatpush1.msra.mxu0 %v3906_v32  ;;  %1664 = vmatprep.mubr.f32.mxu0 %v3907_v38 }
 0x5ba   :  { %1702 = vmatpush1.msra.mxu1 %v3908_v47  ;;  %1735 = vmatprep.mubr.f32.mxu1 %v3907_v38 }
 0x5bb   :  { %1770 = vmatprep.subr.mxu0 %v3909_v12  ;;  %1841 = vmatprep.subr.mxu1 %v3910_v13 }
 0x65a   :  { %v1496_v46 = vpop.f32.mrf.mxu0  ;;  %v1567_v54 = vpop.f32.mrf.mxu1 }
 0x65b   :  { %v1572_v44 = vadd.f32 %v1496_v46, %v3911_v41  ;;  %v1574_v38 = vadd.f32 %v1567_v54, %v3914_v48 }
 0x65c   :  { %v1498_v45 = vpop.f32.mrf.mxu0  ;;  %v1569_v24 = vpop.f32.mrf.mxu1 }
 0x65d   :  { %v2084_v35 = vmul.f32 -1.442695, %v1572_v44  ;;  %v1573_v52 = vadd.f32 %v1498_v45, %v3912_v39  ;;  %v1575_v47 = vadd.f32 %v1569_v24, %v3913_v43 }
 0x65f   :  { %2235 = vpow2.f32 %v2084_v35  ;;  %v2085_v32 = vmul.f32 -1.442695, %v1573_v52  ;;  %v2086_v55 = vmul.f32 -1.442695, %v1575_v47  ;;  %v1954_v47 = vld [vmem:[%s3630_s6 + $0x70] sm:$0xff] }
 0x661   :  { %2237 = vpow2.f32 %v2085_v32 }
 0x662   :  { %2239 = vtanh.f32 %v1574_v38  ;;  %v1955_v38 = vld [vmem:[%s3630_s6 + $0x78] sm:$0xff] }
 0x663   :  { %2241 = vpow2.f32 %v2086_v55 }
 0x66c   :  { %v2236_v12 = vpop.eup %2235 }
 0x66d   :  { %v1579_v36 = vadd.f32 1.0, %v2236_v12  ;;  %v1953_v12 = vld [vmem:[%s3630_s6 + $0x68] sm:$0xff] }
 0x66e   :  { %v2238_v13 = vpop.eup %2237 }
 0x66f   :  { %2243 = vrcp.f32 %v1579_v36  ;;  %v1585_v46 = vadd.f32 1.0, %v2238_v13  ;;  %v2240_v44 = vpop.eup %2239  ;;  %v1952_v13 = vld [vmem:[%s3630_s6 + $0x60] sm:$0xff] }
 0x670   :  { %v2242_v41 = vpop.eup %2241 }
 0x671   :  { %2245 = vrcp.f32 %v1585_v46  ;;  %v1592_v39 = vadd.f32 1.0, %v2242_v41  ;;  %v1951_v46 = vld [vmem:[%s3630_s6 + $0x58] sm:$0xff]  ;;  %v1949_v41 = vld [vmem:[%s3630_s6 + $0x48] sm:$0xff] }
 0x673   :  { %2247 = vrcp.f32 %v1592_v39  ;;  %v1945_v39 = vld [vmem:[%s3630_s6 + $0x28] sm:$0xff] }
 0x67c   :  { %v2244_v35 = vpop.eup %2243 }
 0x67d   :  { %v1596_v45 = vmul.f32 %v2244_v35, %v2240_v44  ;;  %v1950_v44 = vld [vmem:[%s3630_s6 + $0x50] sm:$0xff]  ;;  %v1948_v35 = vld [vmem:[%s3630_s6 + $0x40] sm:$0xff] }
 0x67e   :  { %v2246_v52 = vpop.eup %2245 }
 0x67f   :  { %v1595_v32 = vmul.f32 %v2246_v52, %v3399_v34  ;;  %v1946_v52 = vld [vmem:[%s3630_s6 + $0x30] sm:$0xff] }
 0x680   :  { %v2248_v48 = vpop.eup %2247 }
 0x681   :  { %v3473_v43 = vadd.f32 %v1596_v45, %v1595_v32  ;;  %v1947_v45 = vld [vmem:[%s3630_s6 + $0x38] sm:$0xff]  ;;  %v1944_v32 = vld [vmem:[%s3630_s6 + $0x20] sm:$0xff] }
 0x683   :  { %2249 = vtanh.f32 %v3473_v43 }
 0x690   :  { %v2250_v24 = vpop.eup %2249 }
 0x691   :  { %v1599_v54 = vmul.f32 %v2250_v24, %v2248_v48  ;;  %v1942_v48 = vld [vmem:[%s3630_s6 + $0x10] sm:$0xff]  ;;  %v1941_v24 = vld [vmem:[%s3630_s6 + $0x8] sm:$0xff] }
 0x693   :  { %1665 = vmatmul.mubr.f32.vlgmr.msra.gmra.mxu0 %v1599_v54  ;;  %1736 = vmatmul.mubr.f32.vlgmr.msra.gmra.mxu1 %v1599_v54  ;;  %v1940_v54 = vld [vmem:[%s3630_s6] sm:$0xff] }
 0x694   :  { %1771 = vmatpush1.msra.mxu0 %v3056_v27  ;;  %1842 = vmatpush1.msra.mxu1 %v3059_v21  ;;  %v3915_v27 = vld [vmem:[#allocation8_spill] sm:$0xff]  ;;  %v3916_v21 = vld [vmem:[#allocation7_spill] sm:$0xff] }
 0x695   :  { %1772 = vmatprep.subr.mxu0 %v3062_v49  ;;  %1843 = vmatprep.subr.mxu1 %v3065_v23  ;;  %v3917_v49 = vld [vmem:[#allocation10_spill] sm:$0xff]  ;;  %v3918_v23 = vld [vmem:[#allocation9_spill] sm:$0xff] }
 0x696   :  { %1773 = vmatpush1.msra.mxu0 %v3068_v26  ;;  %1844 = vmatpush1.msra.mxu1 %v3071_v62  ;;  %v3919_v26 = vld [vmem:[#allocation12_spill] sm:$0xff]  ;;  %v3920_v62 = vld [vmem:[#allocation11_spill] sm:$0xff] }
 0x697   :  { %1774 = vmatprep.subr.mxu0 %v3074_v16  ;;  %1845 = vmatprep.subr.mxu1 %v3077_v17  ;;  %v3921_v16 = vld [vmem:[#allocation14_spill] sm:$0xff]  ;;  %v3922_v17 = vld [vmem:[#allocation13_spill] sm:$0xff] }
 0x698   :  { %1775 = vmatpush1.msra.mxu0 %v3080_v42  ;;  %1846 = vmatpush1.msra.mxu1 %v3083_v40  ;;  %v3923_v42 = vld [vmem:[#allocation16_spill] sm:$0xff]  ;;  %v3924_v40 = vld [vmem:[#allocation15_spill] sm:$0xff] }
 0x699   :  { %1776 = vmatprep.subr.mxu0 %v3086_v1  ;;  %1847 = vmatprep.subr.mxu1 %v3089_v18  ;;  %v3925_v1 = vld [vmem:[#allocation18_spill] sm:$0xff]  ;;  %v3926_v18 = vld [vmem:[#allocation17_spill] sm:$0xff] }
 0x69a   :  { %1777 = vmatpush1.msra.mxu0 %v3092_v20  ;;  %1848 = vmatpush1.msra.mxu1 %v3171_v61  ;;  %v3927_v20 = vld [vmem:[#allocation20_spill] sm:$0xff]  ;;  %v3929_v61 = vld [vmem:[#allocation22_spill] sm:$0xff] }
 0x69b   :  { %1778 = vmatprep.subr.mxu0 %v3096_v15  ;;  %1849 = vmatprep.subr.mxu1 %v3175_v28  ;;  %v3928_v15 = vld [vmem:[#allocation19_spill] sm:$0xff]  ;;  %v3930_v28 = vld [vmem:[#allocation21_spill] sm:$0xff] }
 0x69c   :  { %1779 = vmatpush1.msra.mxu0 %v3178_v22  ;;  %1850 = vmatpush1.msra.mxu1 %v3181_v11  ;;  %v3931_v22 = vmov 0.0   ;;  %v3932_v11 = vld [vmem:[#allocation24_spill] sm:$0xff] }
 0x69d   :  { %1780 = vmatprep.subr.mxu0 %v3184_v8  ;;  %1851 = vmatprep.subr.mxu1 %v3187_v37  ;;  %v3933_v37 = vld [vmem:[#allocation54_spill] sm:$0xff] }
 0x69e   :  { %1781 = vmatpush1.msra.mxu0 %v3190_v9  ;;  %1852 = vmatpush1.msra.mxu1 %v3193_v14 }
 0x69f   :  { %1782 = vmatprep.subr.mxu0 %v3196_v56  ;;  %1853 = vmatprep.subr.mxu1 %v3199_v30  ;;  %v3934_v30 = vld [vmem:[#allocation56_spill] sm:$0xff] }
 0x6a0   :  { %1783 = vmatpush1.msra.mxu0 %v3202_v25  ;;  %1854 = vmatpush1.msra.mxu1 %v3205_v19 }
 0x6a1   :  { %1784 = vmatprep.subr.mxu0 %v3208_v29  ;;  %1855 = vmatprep.subr.mxu1 %v3211_v33 }
 0x6a2   :  { %1785 = vmatpush1.msra.mxu0 %v3214_v50  ;;  %1856 = vmatpush1.msra.mxu1 %v3217_v51  ;;  %v3935_v50 = vld [vmem:[#allocation57_spill] sm:$0xff] }
 0x6a3   :  { %1786 = vmatprep.subr.mxu0 %v3220_v53  ;;  %1857 = vmatprep.subr.mxu1 %v3223_v57  ;;  %v3936_v53 = vld [vmem:[#allocation55_spill] sm:$0xff] }
 0x6a4   :  { %1787 = vmatpush1.msra.mxu0 %v3226_v58  ;;  %1858 = vmatpush1.msra.mxu1 %v3229_v59 }
 0x6a5   :  { %1788 = vmatprep.subr.mxu0 %v3232_v60  ;;  %1859 = vmatprep.subr.mxu1 %v3235_v63 }
 0x6a6   :  { %1789 = vmatpush1.msra.mxu0 %v3238_v0  ;;  %1860 = vmatpush1.msra.mxu1 %v3241_v2 }
 0x6a7   :  { %1790 = vmatprep.subr.mxu0 %v3244_v3  ;;  %1861 = vmatprep.subr.mxu1 %v3247_v4 }
 0x6a8   :  { %1791 = vmatpush1.msra.mxu0 %v3250_v5  ;;  %1862 = vmatpush1.msra.mxu1 %v3253_v6 }
 0x6a9   :  { %1792 = vmatprep.subr.mxu0 %v3256_v7  ;;  %1863 = vmatprep.subr.mxu1 %v3259_v10 }
 0x6aa   :  { %1793 = vmatpush1.msra.mxu0 %v3262_v31  ;;  %1864 = vmatpush1.msra.mxu1 %v3915_v27 }
 0x6ab   :  { %1794 = vmatprep.subr.mxu0 %v3916_v21  ;;  %1865 = vmatprep.subr.mxu1 %v3917_v49  ;;  %v3937_v21 = vld [vmem:[#allocation58_spill] sm:$0xff] }
 0x6ac   :  { %1795 = vmatpush1.msra.mxu0 %v3918_v23  ;;  %1866 = vmatpush1.msra.mxu1 %v3919_v26 }
 0x6ad   :  { %1796 = vmatprep.subr.mxu0 %v3920_v62  ;;  %1867 = vmatprep.subr.mxu1 %v3921_v16  ;;  %v3938_v62 = vld [vmem:[#allocation60_spill] sm:$0xff] }
 0x6ae   :  { %1797 = vmatpush1.msra.mxu0 %v3922_v17  ;;  %1868 = vmatpush1.msra.mxu1 %v3923_v42 }
 0x6af   :  { %1798 = vmatprep.subr.mxu0 %v3924_v40  ;;  %1869 = vmatprep.subr.mxu1 %v3925_v1  ;;  %v3939_v1 = vld [vmem:[#allocation61_spill] sm:$0xff] }
 0x6b0   :  { %1799 = vmatpush1.msra.mxu0 %v3926_v18  ;;  %1870 = vmatpush1.msra.mxu1 %v3927_v20  ;;  %v3940_v20 = vld [vmem:[#allocation59_spill] sm:$0xff] }
 0x6b1   :  { %1800 = vmatprep.subr.mxu0 %v3928_v15  ;;  %1871 = vmatprep.subr.mxu1 %v3929_v61 }
 0x6b2   :  { %1801 = vmatpush1.msra.mxu0 %v3930_v28  ;;  %1834 = vmatprep.mubr.f32.mxu0 %v3931_v22 }
 0x6b3   :  { %1872 = vmatpush1.msra.mxu1 %v3932_v11  ;;  %1905 = vmatprep.mubr.f32.mxu1 %v3931_v22 }
 0x6b4   :  { %2112 = vmatprep.subr.mxu0 %v3931_v22 }
 0x753   :  { %v1666_v8 = vpop.f32.mrf.mxu0  ;;  %v1737_v19 = vpop.f32.mrf.mxu1 }
 0x754   :  { %v1742_v9 = vadd.f32 %v1666_v8, %v3933_v37  ;;  %v1744_v57 = vadd.f32 %v1737_v19, %v3936_v53  ;;  %v2093_v53 = vld [vmem:[%s3631_s7] ss:$0 sm:$0xff] }
 0x755   :  { %v1668_v14 = vpop.f32.mrf.mxu0  ;;  %v1739_v33 = vpop.f32.mrf.mxu1 }
 0x756   :  { %v2087_v56 = vmul.f32 -1.442695, %v1742_v9  ;;  %v1743_v25 = vadd.f32 %v1668_v14, %v3934_v30  ;;  %v1745_v51 = vadd.f32 %v1739_v33, %v3935_v50 }
 0x758   :  { %2251 = vpow2.f32 %v2087_v56  ;;  %v2088_v29 = vmul.f32 -1.442695, %v1743_v25  ;;  %v2089_v58 = vmul.f32 -1.442695, %v1745_v51 }
 0x75a   :  { %2253 = vpow2.f32 %v2088_v29 }
 0x75b   :  { %2255 = vtanh.f32 %v1744_v57 }
 0x75c   :  { %2257 = vpow2.f32 %v2089_v58 }
 0x765   :  { %v2252_v59 = vpop.eup %2251 }
 0x766   :  { %v1749_v60 = vadd.f32 1.0, %v2252_v59 }
 0x767   :  { %v2254_v63 = vpop.eup %2253 }
 0x768   :  { %2259 = vrcp.f32 %v1749_v60  ;;  %v1755_v0 = vadd.f32 1.0, %v2254_v63  ;;  %v2256_v2 = vpop.eup %2255 }
 0x769   :  { %v2258_v3 = vpop.eup %2257 }
 0x76a   :  { %2261 = vrcp.f32 %v1755_v0  ;;  %v1762_v7 = vadd.f32 1.0, %v2258_v3 }
 0x76c   :  { %2263 = vrcp.f32 %v1762_v7 }
 0x775   :  { %v2260_v4 = vpop.eup %2259 }
 0x776   :  { %v1766_v5 = vmul.f32 %v2260_v4, %v2256_v2 }
 0x777   :  { %v2262_v6 = vpop.eup %2261 }
 0x778   :  { %v1765_v10 = vmul.f32 %v2262_v6, %v3473_v43  ;;  %v1943_v43 = vld [vmem:[%s3630_s6 + $0x18] sm:$0xff] }
 0x779   :  { %v2264_v34 = vpop.eup %2263 }
 0x77a   :  { %v3546_v31 = vadd.f32 %v1766_v5, %v1765_v10 }
 0x77c   :  { %2265 = vtanh.f32 %v3546_v31 }
 0x789   :  { %v2266_v36 = vpop.eup %2265 }
 0x78a   :  { %v1769_v55 = vmul.f32 %v2266_v36, %v2264_v34 }
 0x78c   :  { %1835 = vmatmul.mubr.f32.vlgmr.msra.gmra.mxu0 %v1769_v55  ;;  %1906 = vmatmul.mubr.f32.vlgmr.msra.gmra.mxu1 %v1769_v55 }
 0x78d   :  { %2113 = vmatpush3.msra.mxu0 %v1955_v38  ;;  %2144 = vmatprep.mubr.msk.f32.mxu0 %vm2378_vm9, %v3931_v22 }
 0x78e   :  { %2114 = vmatprep.subr.mxu0 %v3931_v22 }
 0x78f   :  { %2115 = vmatpush3.msra.mxu0 %v1954_v47 }
 0x790   :  { %2116 = vmatprep.subr.mxu0 %v3931_v22 }
 0x791   :  { %2117 = vmatpush3.msra.mxu0 %v1953_v12 }
 0x792   :  { %2118 = vmatprep.subr.mxu0 %v3931_v22 }
 0x793   :  { %2119 = vmatpush3.msra.mxu0 %v1952_v13 }
 0x794   :  { %2120 = vmatprep.subr.mxu0 %v3931_v22 }
 0x795   :  { %2121 = vmatpush3.msra.mxu0 %v1951_v46 }
 0x796   :  { %2122 = vmatprep.subr.mxu0 %v3931_v22 }
 0x797   :  { %2123 = vmatpush3.msra.mxu0 %v1950_v44 }
 0x798   :  { %2124 = vmatprep.subr.mxu0 %v3931_v22 }
 0x799   :  { %2125 = vmatpush3.msra.mxu0 %v1949_v41 }
 0x79a   :  { %2126 = vmatprep.subr.mxu0 %v3931_v22 }
 0x79b   :  { %2127 = vmatpush3.msra.mxu0 %v1948_v35 }
 0x79c   :  { %2128 = vmatprep.subr.mxu0 %v3931_v22 }
 0x79d   :  { %2129 = vmatpush3.msra.mxu0 %v1947_v45 }
 0x79e   :  { %2130 = vmatprep.subr.mxu0 %v3931_v22 }
 0x79f   :  { %2131 = vmatpush3.msra.mxu0 %v1946_v52 }
 0x7a0   :  { %2132 = vmatprep.subr.mxu0 %v3931_v22 }
 0x7a1   :  { %2133 = vmatpush3.msra.mxu0 %v1945_v39 }
 0x7a2   :  { %2134 = vmatprep.subr.mxu0 %v3931_v22 }
 0x7a3   :  { %2135 = vmatpush3.msra.mxu0 %v1944_v32 }
 0x7a4   :  { %2136 = vmatprep.subr.mxu0 %v3931_v22 }
 0x7a5   :  { %2137 = vmatpush3.msra.mxu0 %v1943_v43 }
 0x7a6   :  { %2138 = vmatprep.subr.mxu0 %v3931_v22 }
 0x7a7   :  { %2139 = vmatpush3.msra.mxu0 %v1942_v48 }
 0x7a8   :  { %2140 = vmatprep.subr.mxu0 %v3931_v22 }
 0x7a9   :  { %2141 = vmatpush3.msra.mxu0 %v1941_v24 }
 0x7aa   :  { %2142 = vmatprep.subr.mxu0 %v3931_v22 }
 0x7ab   :  { %2143 = vmatpush3.msra.mxu0 %v1940_v54 }
 0x84c   :  { %v1836_v27 = vpop.f32.mrf.mxu0  ;;  %v1907_v17 = vpop.f32.mrf.mxu1 }
 0x84d   :  { %v1912_v49 = vadd.f32 %v1836_v27, %v3937_v21  ;;  %v1914_v15 = vadd.f32 %v1907_v17, %v3940_v20 }
 0x84e   :  { %v1838_v23 = vpop.f32.mrf.mxu0  ;;  %v1909_v40 = vpop.f32.mrf.mxu1 }
 0x84f   :  { %v2090_v26 = vmul.f32 -1.442695, %v1912_v49  ;;  %v1913_v16 = vadd.f32 %v1838_v23, %v3938_v62  ;;  %v1915_v18 = vadd.f32 %v1909_v40, %v3939_v1 }
 0x851   :  { %2267 = vpow2.f32 %v2090_v26  ;;  %v2091_v42 = vmul.f32 -1.442695, %v1913_v16  ;;  %v2092_v61 = vmul.f32 -1.442695, %v1915_v18 }
 0x853   :  { %2269 = vpow2.f32 %v2091_v42 }
 0x854   :  { %2271 = vtanh.f32 %v1914_v15 }
 0x855   :  { %2273 = vpow2.f32 %v2092_v61 }
 0x85e   :  { %v2268_v28 = vpop.eup %2267 }
 0x85f   :  { %v1919_v22 = vadd.f32 1.0, %v2268_v28 }
 0x860   :  { %v2270_v11 = vpop.eup %2269 }
 0x861   :  { %2275 = vrcp.f32 %v1919_v22  ;;  %v1925_v8 = vadd.f32 1.0, %v2270_v11  ;;  %v2272_v37 = vpop.eup %2271 }
 0x862   :  { %v2274_v9 = vpop.eup %2273 }
 0x863   :  { %2277 = vrcp.f32 %v1925_v8  ;;  %v1932_v25 = vadd.f32 1.0, %v2274_v9 }
 0x865   :  { %2279 = vrcp.f32 %v1932_v25 }
 0x86e   :  { %v2276_v14 = vpop.eup %2275 }
 0x86f   :  { %v1936_v56 = vmul.f32 %v2276_v14, %v2272_v37 }
 0x870   :  { %v2278_v30 = vpop.eup %2277 }
 0x871   :  { %v1935_v19 = vmul.f32 %v2278_v30, %v3546_v31 }
 0x872   :  { %v2280_v33 = vpop.eup %2279 }
 0x873   :  { %v1937_v29 = vadd.f32 %v1936_v56, %v1935_v19 }
 0x875   :  { %2281 = vtanh.f32 %v1937_v29 }
 0x882   :  { %v2282_v50 = vpop.eup %2281 }
 0x883   :  { %v1939_v51 = vmul.f32 %v2282_v50, %v2280_v33 }
 0x885   :  { %2145 = vmatmul.mubr.f32.vlgmr.msra.gmra.mxu0 %v1939_v51 }
 0x945   :  { %v2029_v57 = vpop.f32.mrf.mxu0 }
 0x946   :  { %v2030_v58 = vadd.f32 %v2093_v53, %v2029_v57 }
 0x947   :  { %v2146_v59 = vpop.f32.mrf.mxu0 }
 0x948   :  { %v2094_v60 = vmul.f32 -1.442695, %v2030_v58 }
 0x94a   :  { %2283 = vpow2.f32 %v2094_v60 }
 0x957   :  { %v2284_v63 = vpop.eup %2283 }
 0x958   :  { %v2036_v0 = vadd.f32 1.0, %v2284_v63 }
 0x95a   :  { %2285 = vrcp.f32 %v2036_v0 }
 0x967   :  { %v2286_v2 = vpop.eup %2285 }
 0x968   :  { %2039 = vst [vmem:[%s3632_s8] sm:$0xff] %v2286_v2 }
 0x969   :  { %2044 = vsyncpa [#allocation3], 1 }

</bundles_post_ra>
